<compile_context>
chip_gen: v5e
topology: v5e:2x2
jax: 0.10.0
libtpu: 0.0.40
codegen_flags: <defaults>
</compile_context>

<pallas_src>
import functools
import math

import jax
import jax.numpy as jnp
from jax.experimental import pallas as pl
from jax.experimental.pallas import tpu as pltpu


def adapter_imo_kernel(x_ref,
                       w_fc1_ref, b_fc1_ref, w_fc2_ref, b_fc2_ref,   # self.mlp
                       ln_g_ref, ln_b_ref,                           # adapter LayerNorm ('in')
                       w_down_ref, b_down_ref,                       # down_proj (CP+gamma folded)
                       w_d1_ref, b_d1_ref,                           # FacT_d1 (Linear R->R)
                       w_up_ref, b_up_ref,                           # up_proj (scale folded)
                       out_ref, *, ln_eps, matmul_dtype):
    x = x_ref[...].astype(jnp.float32)                               # (TM, D), f32
    x_mm = x.astype(matmul_dtype)                                    # matmul operand only

    # ---- residual = self.mlp(x): Linear -> GELU -> Linear (bf16 MXU, f32 acc)
    h = jnp.dot(x_mm, w_fc1_ref[...],
                preferred_element_type=jnp.float32) + b_fc1_ref[...]
    h = jax.nn.gelu(h, approximate=True)
    residual = (jnp.dot(h.astype(matmul_dtype), w_fc2_ref[...],
                        preferred_element_type=jnp.float32) + b_fc2_ref[...])

    # ---- adapter_layernorm_option == 'in': LayerNorm over d_model (f32 VPU) ----
    mean = jnp.mean(x, axis=-1, keepdims=True)
    var = jnp.mean(jnp.square(x - mean), axis=-1, keepdims=True)
    x_ln = (x - mean) * jax.lax.rsqrt(var + ln_eps) * ln_g_ref[...] + ln_b_ref[...]

    # ---- down_proj; dp*CP + gamma*dp == x_ln @ (w_down*(CP+gamma)) + b_down*(CP+gamma)
    dp = (jnp.dot(x_ln.astype(matmul_dtype), w_down_ref[...],
                  preferred_element_type=jnp.float32) + b_down_ref[...])

    # ---- FacT_d1 (Linear) -> ReLU ----
    down = (jnp.dot(dp.astype(matmul_dtype), w_d1_ref[...],
                    preferred_element_type=jnp.float32) + b_d1_ref[...])
    down = jnp.maximum(down, 0.0)
    # TODO(synk): dropout(p=0.1) is identity at inference (training=False); not emitted.

    # ---- up_proj (scale already folded) + residual add ----
    up = (jnp.dot(down.astype(matmul_dtype), w_up_ref[...],
                  preferred_element_type=jnp.float32) + b_up_ref[...])
    out_ref[...] = (up + residual).astype(out_ref.dtype)


def adapter_imo_forward(x, params, *, idx, scale=1.0, ln_eps=1e-5,
                        tm=256, matmul_dtype=jnp.bfloat16):
    """x: (B, S, D); all Linear weights stored pre-transposed (in_dim, out_dim)."""
    B, S, D = x.shape
    N = B * S
    H = params["w_fc1"].shape[1]
    R = params["w_down"].shape[1]                                    # bottleneck (= 16)

    # ---- tiny wrapper glue: exact algebraic folds ---------------------------
    CP = (params["FacT_c"] @ params["FacT_p"])[..., idx]             # (R,)
    cpg = (CP + params["gamma"]).astype(jnp.float32)                 # (R,)
    w_down = params["w_down"] * cpg[None, :]
    b_down = params["b_down"] * cpg[None, :]
    w_up = params["w_up"] * scale
    b_up = params["b_up"] * scale

    # Matmul operands in bf16 (f32 accumulation inside the kernel).  Biases
    # and LayerNorm params stay f32 (element-wise path; v5e-safe).
    wmm = lambda w: w.astype(matmul_dtype)

    # ---- grid + tail padding (no tokens silently dropped) -------------------
    num_tiles = pl.cdiv(N, tm)
    Np = num_tiles * tm
    x2 = x.reshape(N, D)
    if Np != N:
        x2 = jnp.pad(x2, ((0, Np - N), (0, 0)))                      # padded rows sliced off below

    # ---- explicit VMEM budget (double-buffered tiles + resident weights) ----
    wbytes = jnp.dtype(matmul_dtype).itemsize
    weight_bytes = (D * H + H * D + D * R + R * R + R * D) * wbytes
    bias_bytes = (H + 4 * D + 2 * R) * 4
    tile_bytes = 2 * tm * D * x.dtype.itemsize                       # x tile + out tile
    inter_bytes = tm * (H + 2 * D + 2 * R) * 4                       # h / residual / dp / down
    need = 2 * (weight_bytes + bias_bytes + tile_bytes) + inter_bytes
    vmem_limit = int(min(max(2 * need, 32 * 1024 * 1024), 64 * 1024 * 1024))
    # TODO(synk): at production D (>=768) on v7x (64 MiB VMEM), single-buffer the
    # grid-invariant weight specs (pipeline_mode) and K-tile w_fc1/w_fc2 over H
    # with an "arbitrary" grid axis + f32 VMEM accumulator instead of this flat budget.

    full = lambda shape: pl.BlockSpec(shape, lambda i: (0, 0))
    kernel = functools.partial(adapter_imo_kernel, ln_eps=ln_eps,
                               matmul_dtype=matmul_dtype)

    out = pl.pallas_call(
        kernel,
        out_shape=jax.ShapeDtypeStruct((Np, D), x.dtype),
        grid_spec=pltpu.PrefetchScalarGridSpec(
            num_scalar_prefetch=0,
            grid=(num_tiles,),
            in_specs=[
                pl.BlockSpec((tm, D), lambda i: (i, 0)),             # x tile
                full((D, H)), full((1, H)),                          # mlp fc1
                full((H, D)), full((1, D)),                          # mlp fc2
                full((1, D)), full((1, D)),                          # LN gamma/beta
                full((D, R)), full((1, R)),                          # down_proj (folded)
                full((R, R)), full((1, R)),                          # FacT_d1
                full((R, D)), full((1, D)),                          # up_proj (folded)
            ],
            out_specs=pl.BlockSpec((tm, D), lambda i: (i, 0)),
        ),
        compiler_params=pltpu.CompilerParams(
            dimension_semantics=("parallel",),   # token tiles shard across v7x's 2 TCs
            vmem_limit_bytes=vmem_limit,
        ),
    )(x2,
      wmm(params["w_fc1"]), params["b_fc1"], wmm(params["w_fc2"]), params["b_fc2"],
      params["ln_g"], params["ln_b"],
      wmm(w_down), b_down,
      wmm(params["w_d1"]), params["b_d1"],
      wmm(w_up), b_up)
    return out[:N].reshape(B, S, D)


def reference(x, params, *, idx, scale, ln_eps):
    """Pure-f32 JAX reference matching the PyTorch module forward."""
    B, S, D = x.shape
    x2 = x.reshape(-1, D)
    h = jax.nn.gelu(x2 @ params["w_fc1"] + params["b_fc1"], approximate=True)
    residual = h @ params["w_fc2"] + params["b_fc2"]
    mean = x2.mean(-1, keepdims=True)
    var = ((x2 - mean) ** 2).mean(-1, keepdims=True)
    xln = (x2 - mean) / jnp.sqrt(var + ln_eps) * params["ln_g"] + params["ln_b"]
    dp = xln @ params["w_down"] + params["b_down"]
    CP = (params["FacT_c"] @ params["FacT_p"])[..., idx]
    pre = dp * CP + params["gamma"] * dp
    down = jnp.maximum(pre @ params["w_d1"] + params["b_d1"], 0.0)
    up = down @ params["w_up"] + params["b_up"]
    return (up * scale + residual).reshape(B, S, D)


if __name__ == "__main__":
    # Small shapes consistent with the module (d_model scaled down, bottleneck=16
    # kept since gamma's dim=16 is hard-coded).  N = 144 tokens with tm=128
    # exercises a 2-tile grid plus a zero-padded tail tile.
    B, S, D = 2, 72, 32
    R = 16                # bottleneck / dim
    H = 4 * D             # mlp hidden
    FACT_RANK, N_LAYERS, IDX = 8, 12, 3
    SCALE, LN_EPS = 1.0, 1e-5

    key = jax.random.PRNGKey(0)
    ks = jax.random.split(key, 16)

    def u(k, shape, bound):
        return jax.random.uniform(k, shape, jnp.float32, -bound, bound)

    params = {
        # self.mlp (Linear -> GELU -> Linear)
        "w_fc1": u(ks[0], (D, H), 1.0 / math.sqrt(D)),
        "b_fc1": u(ks[1], (1, H), 1.0 / math.sqrt(D)),
        "w_fc2": u(ks[2], (H, D), 1.0 / math.sqrt(H)),
        "b_fc2": u(ks[3], (1, D), 1.0 / math.sqrt(H)),
        # adapter LayerNorm ('in')
        "ln_g": jnp.ones((1, D), jnp.float32),
        "ln_b": jnp.zeros((1, D), jnp.float32),
        # down_proj: kaiming_uniform(a=sqrt(5)) -> U(-1/sqrt(fan_in), 1/sqrt(fan_in))
        "w_down": u(ks[4], (D, R), 1.0 / math.sqrt(D)),
        "b_down": jnp.zeros((1, R), jnp.float32),
        # up_proj (module zero-inits; small random values to exercise compute)
        "w_up": u(ks[5], (R, D), 0.02),
        "b_up": jnp.zeros((1, D), jnp.float32),
        # FacT factors and d1 linear (16 -> 16)
        "FacT_c": u(ks[6], (R, FACT_RANK), 0.5),
        "FacT_p": u(ks[7], (FACT_RANK, N_LAYERS), 0.5),
        "w_d1": u(ks[8], (R, R), 1.0 / math.sqrt(R)),
        "b_d1": u(ks[9], (1, R), 1.0 / math.sqrt(R)),
        # layer-scale gamma (ones, as in __init__)
        "gamma": jnp.ones((R,), jnp.float32),
    }

    x = jax.random.normal(ks[10], (B, S, D), jnp.float32)

    # tm=128 here (multiple of the v5e MXU M dim) so the tiny demo exercises a
    # multi-tile grid with a padded tail; default tm=256 targets v6e/v7x.
    out = adapter_imo_forward(x, params, idx=IDX, scale=SCALE, ln_eps=LN_EPS, tm=128)
    out = jax.block_until_ready(out)

    ref = reference(x, params, idx=IDX, scale=SCALE, ln_eps=LN_EPS)
    assert out.shape == (B, S, D)
    # bf16 matmul operands + f32 accumulation vs. all-f32 reference -> bf16-level tolerance
    assert jnp.allclose(out, ref, atol=3e-2, rtol=3e-2), "mismatch vs pure-JAX reference"

    print("KERNEL_OK")
</pallas_src>

<mosaic_0001>
module attributes {stable_mosaic.version = 11 : i64} {
  func.func @adapter_imo_kernel(%arg0: i32, %arg1: memref<128x32xf32, #tpu.memory_space<vmem>>, %arg2: memref<32x128xbf16, #tpu.memory_space<vmem>>, %arg3: memref<1x128xf32, #tpu.memory_space<vmem>>, %arg4: memref<128x32xbf16, #tpu.memory_space<vmem>>, %arg5: memref<1x32xf32, #tpu.memory_space<vmem>>, %arg6: memref<1x32xf32, #tpu.memory_space<vmem>>, %arg7: memref<1x32xf32, #tpu.memory_space<vmem>>, %arg8: memref<32x16xbf16, #tpu.memory_space<vmem>>, %arg9: memref<1x16xf32, #tpu.memory_space<vmem>>, %arg10: memref<16x16xbf16, #tpu.memory_space<vmem>>, %arg11: memref<1x16xf32, #tpu.memory_space<vmem>>, %arg12: memref<16x32xbf16, #tpu.memory_space<vmem>>, %arg13: memref<1x32xf32, #tpu.memory_space<vmem>>, %arg14: memref<128x32xf32, #tpu.memory_space<vmem>>) attributes {dimension_semantics = [#tpu.dimension_semantics<parallel>], iteration_bounds = array<i64: 2>, scalar_prefetch = 0 : i64, scratch_operands = 0 : i64, tpu.core_type = #tpu.core_type<tc>, window_params = [{transform_indices = @transform_0, window_bounds = array<i64: 128, 32>}, {pipeline_mode = #tpu.pipeline_mode<synchronous>, transform_indices = @transform_1, window_bounds = array<i64: 32, 128>}, {pipeline_mode = #tpu.pipeline_mode<synchronous>, transform_indices = @transform_2, window_bounds = array<i64: 1, 128>}, {pipeline_mode = #tpu.pipeline_mode<synchronous>, transform_indices = @transform_3, window_bounds = array<i64: 128, 32>}, {pipeline_mode = #tpu.pipeline_mode<synchronous>, transform_indices = @transform_4, window_bounds = array<i64: 1, 32>}, {pipeline_mode = #tpu.pipeline_mode<synchronous>, transform_indices = @transform_5, window_bounds = array<i64: 1, 32>}, {pipeline_mode = #tpu.pipeline_mode<synchronous>, transform_indices = @transform_6, window_bounds = array<i64: 1, 32>}, {pipeline_mode = #tpu.pipeline_mode<synchronous>, transform_indices = @transform_7, window_bounds = array<i64: 32, 16>}, {pipeline_mode = #tpu.pipeline_mode<synchronous>, transform_indices = @transform_8, window_bounds = array<i64: 1, 16>}, {pipeline_mode = #tpu.pipeline_mode<synchronous>, transform_indices = @transform_9, window_bounds = array<i64: 16, 16>}, {pipeline_mode = #tpu.pipeline_mode<synchronous>, transform_indices = @transform_10, window_bounds = array<i64: 1, 16>}, {pipeline_mode = #tpu.pipeline_mode<synchronous>, transform_indices = @transform_11, window_bounds = array<i64: 16, 32>}, {pipeline_mode = #tpu.pipeline_mode<synchronous>, transform_indices = @transform_12, window_bounds = array<i64: 1, 32>}, {transform_indices = @transform_13, window_bounds = array<i64: 128, 32>}]} {
    %c0 = arith.constant 0 : index
    %c0_0 = arith.constant 0 : index
    %0 = vector.load %arg1[%c0, %c0_0] : memref<128x32xf32, #tpu.memory_space<vmem>>, vector<128x32xf32>
    %1 = arith.truncf %0 : vector<128x32xf32> to vector<128x32xbf16>
    %c0_1 = arith.constant 0 : index
    %c0_2 = arith.constant 0 : index
    %2 = vector.load %arg2[%c0_1, %c0_2] : memref<32x128xbf16, #tpu.memory_space<vmem>>, vector<32x128xbf16>
    %cst = arith.constant dense<0.000000e+00> : vector<128x128xf32>
    %3 = tpu.matmul %1, %2, %cst {dimension_numbers = #tpu.dot_dimension_numbers<[1], [0], [0], [1], [0, 0, 1, 1], [], []>} : vector<128x32xbf16>, vector<32x128xbf16>, vector<128x128xf32> -> vector<128x128xf32>
    %c0_3 = arith.constant 0 : index
    %c0_4 = arith.constant 0 : index
    %4 = vector.load %arg3[%c0_3, %c0_4] : memref<1x128xf32, #tpu.memory_space<vmem>>, vector<1x128xf32>
    %5 = vector.broadcast %4 : vector<1x128xf32> to vector<128x128xf32>
    %6 = arith.addf %3, %5 : vector<128x128xf32>
    %7 = arith.mulf %6, %6 : vector<128x128xf32>
    %8 = arith.mulf %6, %7 : vector<128x128xf32>
    %cst_5 = arith.constant 4.471500e-02 : f32
    %9 = vector.broadcast %cst_5 : f32 to vector<128x128xf32>
    %10 = arith.mulf %9, %8 : vector<128x128xf32>
    %11 = arith.addf %6, %10 : vector<128x128xf32>
    %cst_6 = arith.constant 0.797884583 : f32
    %12 = vector.broadcast %cst_6 : f32 to vector<128x128xf32>
    %13 = arith.mulf %12, %11 : vector<128x128xf32>
    %14 = math.tanh %13 : vector<128x128xf32>
    %cst_7 = arith.constant 1.000000e+00 : f32
    %15 = vector.broadcast %cst_7 : f32 to vector<128x128xf32>
    %16 = arith.addf %15, %14 : vector<128x128xf32>
    %cst_8 = arith.constant 5.000000e-01 : f32
    %17 = vector.broadcast %cst_8 : f32 to vector<128x128xf32>
    %18 = arith.mulf %17, %16 : vector<128x128xf32>
    %19 = arith.mulf %6, %18 : vector<128x128xf32>
    %20 = arith.truncf %19 : vector<128x128xf32> to vector<128x128xbf16>
    %c0_9 = arith.constant 0 : index
    %c0_10 = arith.constant 0 : index
    %21 = vector.load %arg4[%c0_9, %c0_10] : memref<128x32xbf16, #tpu.memory_space<vmem>>, vector<128x32xbf16>
    %cst_11 = arith.constant dense<0.000000e+00> : vector<128x32xf32>
    %22 = tpu.matmul %20, %21, %cst_11 {dimension_numbers = #tpu.dot_dimension_numbers<[1], [0], [0], [1], [0, 0, 1, 1], [], []>} : vector<128x128xbf16>, vector<128x32xbf16>, vector<128x32xf32> -> vector<128x32xf32>
    %c0_12 = arith.constant 0 : index
    %c0_13 = arith.constant 0 : index
    %23 = vector.load %arg5[%c0_12, %c0_13] : memref<1x32xf32, #tpu.memory_space<vmem>>, vector<1x32xf32>
    %24 = vector.broadcast %23 : vector<1x32xf32> to vector<128x32xf32>
    %25 = arith.addf %22, %24 : vector<128x32xf32>
    %cst_14 = arith.constant dense<0.000000e+00> : vector<128xf32>
    %26 = vector.multi_reduction <add>, %0, %cst_14 [1] : vector<128x32xf32> to vector<128xf32>
    %27 = vector.shape_cast %26 : vector<128xf32> to vector<128x1xf32>
    %cst_15 = arith.constant 3.200000e+01 : f32
    %28 = vector.broadcast %cst_15 : f32 to vector<128x1xf32>
    %29 = arith.divf %27, %28 : vector<128x1xf32>
    %30 = vector.broadcast %29 : vector<128x1xf32> to vector<128x32xf32>
    %31 = arith.subf %0, %30 : vector<128x32xf32>
    %32 = arith.mulf %31, %31 : vector<128x32xf32>
    %cst_16 = arith.constant dense<0.000000e+00> : vector<128xf32>
    %33 = vector.multi_reduction <add>, %32, %cst_16 [1] : vector<128x32xf32> to vector<128xf32>
    %34 = vector.shape_cast %33 : vector<128xf32> to vector<128x1xf32>
    %cst_17 = arith.constant 3.200000e+01 : f32
    %35 = vector.broadcast %cst_17 : f32 to vector<128x1xf32>
    %36 = arith.divf %34, %35 : vector<128x1xf32>
    %37 = vector.broadcast %29 : vector<128x1xf32> to vector<128x32xf32>
    %38 = arith.subf %0, %37 : vector<128x32xf32>
    %cst_18 = arith.constant 9.99999974E-6 : f32
    %39 = vector.broadcast %cst_18 : f32 to vector<128x1xf32>
    %40 = arith.addf %36, %39 : vector<128x1xf32>
    %41 = math.rsqrt %40 : vector<128x1xf32>
    %42 = vector.broadcast %41 : vector<128x1xf32> to vector<128x32xf32>
    %43 = arith.mulf %38, %42 : vector<128x32xf32>
    %c0_19 = arith.constant 0 : index
    %c0_20 = arith.constant 0 : index
    %44 = vector.load %arg6[%c0_19, %c0_20] : memref<1x32xf32, #tpu.memory_space<vmem>>, vector<1x32xf32>
    %45 = vector.broadcast %44 : vector<1x32xf32> to vector<128x32xf32>
    %46 = arith.mulf %43, %45 : vector<128x32xf32>
    %c0_21 = arith.constant 0 : index
    %c0_22 = arith.constant 0 : index
    %47 = vector.load %arg7[%c0_21, %c0_22] : memref<1x32xf32, #tpu.memory_space<vmem>>, vector<1x32xf32>
    %48 = vector.broadcast %47 : vector<1x32xf32> to vector<128x32xf32>
    %49 = arith.addf %46, %48 : vector<128x32xf32>
    %50 = arith.truncf %49 : vector<128x32xf32> to vector<128x32xbf16>
    %c0_23 = arith.constant 0 : index
    %c0_24 = arith.constant 0 : index
    %51 = vector.load %arg8[%c0_23, %c0_24] : memref<32x16xbf16, #tpu.memory_space<vmem>>, vector<32x16xbf16>
    %cst_25 = arith.constant dense<0.000000e+00> : vector<128x16xf32>
    %52 = tpu.matmul %50, %51, %cst_25 {dimension_numbers = #tpu.dot_dimension_numbers<[1], [0], [0], [1], [0, 0, 1, 1], [], []>} : vector<128x32xbf16>, vector<32x16xbf16>, vector<128x16xf32> -> vector<128x16xf32>
    %c0_26 = arith.constant 0 : index
    %c0_27 = arith.constant 0 : index
    %53 = vector.load %arg9[%c0_26, %c0_27] : memref<1x16xf32, #tpu.memory_space<vmem>>, vector<1x16xf32>
    %54 = vector.broadcast %53 : vector<1x16xf32> to vector<128x16xf32>
    %55 = arith.addf %52, %54 : vector<128x16xf32>
    %56 = arith.truncf %55 : vector<128x16xf32> to vector<128x16xbf16>
    %c0_28 = arith.constant 0 : index
    %c0_29 = arith.constant 0 : index
    %57 = vector.load %arg10[%c0_28, %c0_29] : memref<16x16xbf16, #tpu.memory_space<vmem>>, vector<16x16xbf16>
    %cst_30 = arith.constant dense<0.000000e+00> : vector<128x16xf32>
    %58 = tpu.matmul %56, %57, %cst_30 {dimension_numbers = #tpu.dot_dimension_numbers<[1], [0], [0], [1], [0, 0, 1, 1], [], []>} : vector<128x16xbf16>, vector<16x16xbf16>, vector<128x16xf32> -> vector<128x16xf32>
    %c0_31 = arith.constant 0 : index
    %c0_32 = arith.constant 0 : index
    %59 = vector.load %arg11[%c0_31, %c0_32] : memref<1x16xf32, #tpu.memory_space<vmem>>, vector<1x16xf32>
    %60 = vector.broadcast %59 : vector<1x16xf32> to vector<128x16xf32>
    %61 = arith.addf %58, %60 : vector<128x16xf32>
    %cst_33 = arith.constant 0.000000e+00 : f32
    %62 = vector.broadcast %cst_33 : f32 to vector<128x16xf32>
    %63 = arith.maximumf %61, %62 : vector<128x16xf32>
    %64 = arith.truncf %63 : vector<128x16xf32> to vector<128x16xbf16>
    %c0_34 = arith.constant 0 : index
    %c0_35 = arith.constant 0 : index
    %65 = vector.load %arg12[%c0_34, %c0_35] : memref<16x32xbf16, #tpu.memory_space<vmem>>, vector<16x32xbf16>
    %cst_36 = arith.constant dense<0.000000e+00> : vector<128x32xf32>
    %66 = tpu.matmul %64, %65, %cst_36 {dimension_numbers = #tpu.dot_dimension_numbers<[1], [0], [0], [1], [0, 0, 1, 1], [], []>} : vector<128x16xbf16>, vector<16x32xbf16>, vector<128x32xf32> -> vector<128x32xf32>
    %c0_37 = arith.constant 0 : index
    %c0_38 = arith.constant 0 : index
    %67 = vector.load %arg13[%c0_37, %c0_38] : memref<1x32xf32, #tpu.memory_space<vmem>>, vector<1x32xf32>
    %68 = vector.broadcast %67 : vector<1x32xf32> to vector<128x32xf32>
    %69 = arith.addf %66, %68 : vector<128x32xf32>
    %70 = arith.addf %69, %25 : vector<128x32xf32>
    %c0_39 = arith.constant 0 : index
    %c0_40 = arith.constant 0 : index
    %71 = vector.load %arg14[%c0_39, %c0_40] : memref<128x32xf32, #tpu.memory_space<vmem>>, vector<128x32xf32>
    tpu.vector_store %arg14[%c0_39, %c0_40], %70 {strides = array<i32>} : memref<128x32xf32, #tpu.memory_space<vmem>>, vector<128x32xf32>,
    return
  }
  func.func @transform_0(%arg0: i32) -> (i32, i32) {
    %c0_i32 = arith.constant 0 : i32
    %c0_i32_0 = arith.constant 0 : i32
    return %arg0, %c0_i32 : i32, i32
  }
  func.func @transform_1(%arg0: i32) -> (i32, i32) {
    %c0_i32 = arith.constant 0 : i32
    %c0_i32_0 = arith.constant 0 : i32
    %c0_i32_1 = arith.constant 0 : i32
    return %c0_i32, %c0_i32_0 : i32, i32
  }
  func.func @transform_2(%arg0: i32) -> (i32, i32) {
    %c0_i32 = arith.constant 0 : i32
    %c0_i32_0 = arith.constant 0 : i32
    %c0_i32_1 = arith.constant 0 : i32
    return %c0_i32, %c0_i32_0 : i32, i32
  }
  func.func @transform_3(%arg0: i32) -> (i32, i32) {
    %c0_i32 = arith.constant 0 : i32
    %c0_i32_0 = arith.constant 0 : i32
    %c0_i32_1 = arith.constant 0 : i32
    return %c0_i32, %c0_i32_0 : i32, i32
  }
  func.func @transform_4(%arg0: i32) -> (i32, i32) {
    %c0_i32 = arith.constant 0 : i32
    %c0_i32_0 = arith.constant 0 : i32
    %c0_i32_1 = arith.constant 0 : i32
    return %c0_i32, %c0_i32_0 : i32, i32
  }
  func.func @transform_5(%arg0: i32) -> (i32, i32) {
    %c0_i32 = arith.constant 0 : i32
    %c0_i32_0 = arith.constant 0 : i32
    %c0_i32_1 = arith.constant 0 : i32
    return %c0_i32, %c0_i32_0 : i32, i32
  }
  func.func @transform_6(%arg0: i32) -> (i32, i32) {
    %c0_i32 = arith.constant 0 : i32
    %c0_i32_0 = arith.constant 0 : i32
    %c0_i32_1 = arith.constant 0 : i32
    return %c0_i32, %c0_i32_0 : i32, i32
  }
  func.func @transform_7(%arg0: i32) -> (i32, i32) {
    %c0_i32 = arith.constant 0 : i32
    %c0_i32_0 = arith.constant 0 : i32
    %c0_i32_1 = arith.constant 0 : i32
    return %c0_i32, %c0_i32_0 : i32, i32
  }
  func.func @transform_8(%arg0: i32) -> (i32, i32) {
    %c0_i32 = arith.constant 0 : i32
    %c0_i32_0 = arith.constant 0 : i32
    %c0_i32_1 = arith.constant 0 : i32
    return %c0_i32, %c0_i32_0 : i32, i32
  }
  func.func @transform_9(%arg0: i32) -> (i32, i32) {
    %c0_i32 = arith.constant 0 : i32
    %c0_i32_0 = arith.constant 0 : i32
    %c0_i32_1 = arith.constant 0 : i32
    return %c0_i32, %c0_i32_0 : i32, i32
  }
  func.func @transform_10(%arg0: i32) -> (i32, i32) {
    %c0_i32 = arith.constant 0 : i32
    %c0_i32_0 = arith.constant 0 : i32
    %c0_i32_1 = arith.constant 0 : i32
    return %c0_i32, %c0_i32_0 : i32, i32
  }
  func.func @transform_11(%arg0: i32) -> (i32, i32) {
    %c0_i32 = arith.constant 0 : i32
    %c0_i32_0 = arith.constant 0 : i32
    %c0_i32_1 = arith.constant 0 : i32
    return %c0_i32, %c0_i32_0 : i32, i32
  }
  func.func @transform_12(%arg0: i32) -> (i32, i32) {
    %c0_i32 = arith.constant 0 : i32
    %c0_i32_0 = arith.constant 0 : i32
    %c0_i32_1 = arith.constant 0 : i32
    return %c0_i32, %c0_i32_0 : i32, i32
  }
  func.func @transform_13(%arg0: i32) -> (i32, i32) {
    %c0_i32 = arith.constant 0 : i32
    %c0_i32_0 = arith.constant 0 : i32
    return %arg0, %c0_i32 : i32, i32
  }
}

</mosaic_0001>

<bundles_post_ra>
// kernel: tpu_custom_call.1
= control target key start
LH: loop header
LB: loop body
LE: loop exit
PB: predicated region body
PF: predicated region fallthrough
CT: control target
= control target key end

     0   :  { %s1902_s25 = smov 0   ;;  %s2684_s0 = inlined_call_operand.vmem [shape: f32[256,32], index: 0, kind: input, shape index: {}]   ;;  %s2685_s1 = inlined_call_operand.vmem [shape: bf16[32,128], index: 1, kind: input, shape index: {}]   ;;  %s2686_s2 = inlined_call_operand.vmem [shape: f32[1,128], index: 2, kind: input, shape index: {}]   ;;  %s2687_s3 = inlined_call_operand.vmem [shape: bf16[128,32], index: 3, kind: input, shape index: {}]   ;;  %s2688_s4 = inlined_call_operand.vmem [shape: f32[1,32], index: 4, kind: input, shape index: {}]   ;;  %s2689_s5 = inlined_call_operand.vmem [shape: f32[1,32], index: 5, kind: input, shape index: {}]   ;;  %s2690_s6 = inlined_call_operand.vmem [shape: f32[1,32], index: 6, kind: input, shape index: {}]   ;;  %s2691_s7 = inlined_call_operand.vmem [shape: bf16[32,16], index: 7, kind: input, shape index: {}]   ;;  %s2692_s8 = inlined_call_operand.vmem [shape: f32[1,16], index: 8, kind: input, shape index: {}]   ;;  %s2693_s9 = inlined_call_operand.vmem [shape: bf16[16,16], index: 9, kind: input, shape index: {}]   ;;  %s2694_s10 = inlined_call_operand.vmem [shape: f32[1,16], index: 10, kind: input, shape index: {}]   ;;  %s2695_s11 = inlined_call_operand.vmem [shape: bf16[16,32], index: 11, kind: input, shape index: {}]   ;;  %s2696_s12 = inlined_call_operand.vmem [shape: f32[1,32], index: 12, kind: input, shape index: {}]   ;;  %s2697_s13 = inlined_call_operand.vmem [shape: f32[256,32], index: 13, kind: output, shape index: {}]  }
   0x1 LB: > { %s1623_s26 = sadd.s32 4294967295, %s1829_s25   ;;  %p1627_p0 = scmp.ge.s32.totalorder %s1829_s25, 1  ;;  %s1829_s25 = sphi %s1902_s25, %s23_s25  }
   0x2   : > { %p388_p1 = scmp.lt.s32.totalorder %s1829_s25, 3 }
   0x4   : > { %p389_p2 = pnand %p1627_p0, %p388_p1 }
   0x5   : > { %s1628_s27 = sshll.u32 (!%p389_p2), %s1623_s26, 4 }
   0x6   : > { %392 = sbr.rel (%p389_p2) target bundleno = 990 (0x3de), region = 72  ;;  %p433_p3 = scmp.lt.s32.totalorder (!%p389_p2), %s1628_s27, 31 }
   0xb   : > { %s2717_s27 = smov (!%p433_p3, %s1628_s27), 31  ;;  %vm489_vm0 = vcmask 261120   ;;  %v1831_v14 = vmov 32.0   ;;  %v1723_v54 = vld [vmem:[%s2685_s1 + $0x8] sm:$0xff] }
   0xc   : > { %s1629_s28 = sshll.u32 %s2717_s27, 3  ;;  %1755 = vrcp.f32 %v1831_v14  ;;  %1736 = vmatpush.bf16.msra.mxu2 %v1723_v54  ;;  %520 = vmatpush.bf16.msra.mxu0 %v1723_v54 }
   0xd   : > { %s1918_s14 = scalar_lea.vmem %s2684_s0, %s1629_s28  ;;  %s2617_s21 = scalar_lea.vmem %s2697_s13, %s1629_s28 }
   0xe   : > { %v1921_v0 = vld [vmem:[%s1918_s14 + $0x10] sm:$0xff]  ;;  %v1924_v1 = vld [vmem:[%s1918_s14] sm:$0xff]  ;;  %v1936_v6 = vld [vmem:[%s1918_s14 + $0x18] sm:$0xff] }
   0xf   : > { %v838_v2 = vsel %vm489_vm0, %v1921_v0, 0.0  ;;  %v832_v3 = vsel %vm489_vm0, %v1924_v1, 0.0  ;;  %v1931_v4 = vld [vmem:[%s1918_s14 + $0x20] sm:$0xff]  ;;  %v1939_v7 = vld [vmem:[%s1918_s14 + $0x8] sm:$0xff]  ;;  %v841_v9 = vsel %vm489_vm0, %v1936_v6, 0.0  ;;  %v1951_v12 = vld [vmem:[%s1918_s14 + $0x30] sm:$0xff] }
  0x10   : > { %839 = vadd.xlane.f32.xlu1 %v838_v2  ;;  %833 = vadd.xlane.f32.xlu0 %v832_v3  ;;  %v844_v5 = vsel %vm489_vm0, %v1931_v4, 0.0  ;;  %v1942_v8 = vld [vmem:[%s1918_s14 + $0x28] sm:$0xff]  ;;  %v835_v10 = vsel %vm489_vm0, %v1939_v7, 0.0  ;;  %v850_v13 = vsel %vm489_vm0, %v1951_v12, 0.0  ;;  %v1969_v34 = vld [vmem:[%s1918_s14 + $0x38] sm:$0xff]  ;;  %v1995_v47 = vld [vmem:[%s1918_s14 + $0x40] sm:$0xff] }
  0x11   : > { %845 = vadd.xlane.f32.xlu2 %v844_v5  ;;  %v847_v11 = vsel %vm489_vm0, %v1942_v8, 0.0  ;;  %v853_v40 = vsel %vm489_vm0, %v1969_v34, 0.0  ;;  %v856_v51 = vsel %vm489_vm0, %v1995_v47, 0.0  ;;  %v2013_v57 = vld [vmem:[%s1918_s14 + $0x58] sm:$0xff]  ;;  %v2016_v58 = vld [vmem:[%s1918_s14 + $0x48] sm:$0xff]  ;;  %v2029_v2 = vld [vmem:[%s1918_s14 + $0x60] sm:$0xff] }
  0x12   : > { %v1756_v15 = vpop.eup %1755  ;;  %v865_v60 = vsel %vm489_vm0, %v2013_v57, 0.0  ;;  %v859_v62 = vsel %vm489_vm0, %v2016_v58, 0.0  ;;  %v2032_v3 = vld [vmem:[%s1918_s14 + $0x50] sm:$0xff]  ;;  %v868_v5 = vsel %vm489_vm0, %v2029_v2, 0.0 }
  0x13   : > { %v881_v16 = vmul.f32 32.0, %v1756_v15  ;;  %vm885_vm1 = vweird.f32 %v1756_v15  ;;  %v2045_v14 = vld [vmem:[%s1918_s14 + $0x70] sm:$0xff] }
  0x15   : > { %v882_v17 = vsub.f32 1.0, %v881_v16  ;;  %v1722_v16 = vld [vmem:[%s2685_s1] sm:$0xff] }
  0x16   : > { %1737 = vmatpush.bf16.msra.mxu2 %v1722_v16  ;;  %521 = vmatpush.bf16.msra.mxu0 %v1722_v16 }
  0x17   : > { %v883_v18 = vmul.f32 %v1756_v15, %v882_v17 }
  0x18   : > { %842 = vadd.xlane.f32.xlu1 %v841_v9  ;;  %836 = vadd.xlane.f32.xlu0 %v835_v10  ;;  %v862_v10 = vsel %vm489_vm0, %v2032_v3, 0.0 }
  0x19   : > { %848 = vadd.xlane.f32.xlu2 %v847_v11  ;;  %v884_v19 = vadd.f32 %v1756_v15, %v883_v18  ;;  %v2040_v11 = vld [vmem:[%s1918_s14 + $0x68] sm:$0xff]  ;;  %v2056_v18 = vld [vmem:[%s1918_s14 + $0x78] sm:$0xff] }
  0x1a   : > { %v467_v17 = vpack.c.bf16 %v2040_v11, %v2029_v2 }
  0x1b   : > { %v1955_v20 = vsel %vm885_vm1, %v1756_v15, %v884_v19  ;;  %v874_v15 = vsel %vm489_vm0, %v2045_v14, 0.0  ;;  %v468_v19 = vpack.c.bf16 %v2056_v18, %v2045_v14 }
  0x1c   : > { %1646 = vmatmul.msk.bf16.vlgmr.msra.gmra.mxu2 %vm489_vm0, %v467_v17 }
  0x21   : > { %851 = vadd.xlane.f32.xlu2 %v850_v13  ;;  %v871_v13 = vsel %vm489_vm0, %v2040_v11, 0.0 }
  0x2c   : > { %1647 = vmatmul.msk.bf16.gmra.mxu2 %vm489_vm0, %v468_v19 }
  0x83   : > { %v840_v21 = vpop.xlane.xlu1 %839  ;;  %v834_v22 = vpop.xlane.xlu0 %833 }
  0x84   : > { %v887_v23 = vmul.f32 %v1955_v20, %v834_v22  ;;  %v846_v24 = vpop.xlane.xlu2 %845  ;;  %v889_v33 = vmul.f32 %v1955_v20, %v840_v21  ;;  %v461_v21 = vpack.c.bf16 %v1939_v7, %v1924_v1 }
  0x85   : > { %v891_v32 = vmul.f32 %v1955_v20, %v846_v24 }
  0x86   : > { %v1959_v25 = vsub.f32 %v1924_v1, %v887_v23  ;;  %v1987_v42 = vsub.f32 %v1921_v0, %v889_v33  ;;  %1640 = vmatmul.msk.bf16.vlgmr.msra.gmra.mxu0 %vm489_vm0, %v461_v21  ;;  %v1733_v23 = vld [vmem:[%s2691_s7 + $0x8] sm:$0xff] }
  0x87   : > { %v1978_v38 = vsub.f32 %v1931_v4, %v891_v32  ;;  %1289 = vmatpush.bf16.msrb.mxu2 %v1733_v23 }
  0x88   : > { %v919_v26 = vmul.f32 %v1959_v25, %v1959_v25  ;;  %v921_v48 = vmul.f32 %v1987_v42, %v1987_v42 }
  0x89   : > { %v923_v46 = vmul.f32 %v1978_v38, %v1978_v38 }
  0x8a   : > { %v935_v27 = vsel %vm489_vm0, %v919_v26, 0.0  ;;  %v941_v52 = vsel %vm489_vm0, %v921_v48, 0.0 }
  0x8b   : > { %v843_v28 = vpop.xlane.xlu1 %842  ;;  %936 = vadd.xlane.f32.xlu0 %v935_v27  ;;  %v837_v29 = vpop.xlane.xlu0 %836  ;;  %v947_v50 = vsel %vm489_vm0, %v923_v46, 0.0  ;;  %v1732_v27 = vld [vmem:[%s2691_s7] sm:$0xff] }
  0x8c   : > { %v890_v30 = vmul.f32 %v1955_v20, %v843_v28  ;;  %v888_v31 = vmul.f32 %v1955_v20, %v837_v29  ;;  %v849_v37 = vpop.xlane.xlu2 %848  ;;  %1290 = vmatpush.bf16.msrb.mxu2 %v1732_v27 }
  0x8d   : > { %v892_v45 = vmul.f32 %v1955_v20, %v849_v37 }
  0x8e   : > { %v1972_v35 = vsub.f32 %v1936_v6, %v890_v30  ;;  %v1975_v36 = vsub.f32 %v1939_v7, %v888_v31 }
  0x8f   : > { %v2000_v49 = vsub.f32 %v1942_v8, %v892_v45 }
  0x90   : > { %v922_v39 = vmul.f32 %v1972_v35, %v1972_v35  ;;  %v920_v41 = vmul.f32 %v1975_v36, %v1975_v36 }
  0x91   : > { %v924_v56 = vmul.f32 %v2000_v49, %v2000_v49 }
  0x92   : > { %v944_v43 = vsel %vm489_vm0, %v922_v39, 0.0  ;;  %v938_v44 = vsel %vm489_vm0, %v920_v41, 0.0 }
  0x93   : > { %945 = vadd.xlane.f32.xlu2 %v944_v43  ;;  %854 = vadd.xlane.f32.xlu0 %v853_v40  ;;  %v950_v61 = vsel %vm489_vm0, %v924_v56, 0.0 }
  0x94   : > { %939 = vadd.xlane.f32.xlu1 %v938_v44  ;;  %v852_v53 = vpop.xlane.xlu2 %851 }
  0x95   : > { %v893_v55 = vmul.f32 %v1955_v20, %v852_v53 }
  0x97   : > { %v2019_v59 = vsub.f32 %v1951_v12, %v893_v55 }
  0x99   : > { %v925_v63 = vmul.f32 %v2019_v59, %v2019_v59 }
  0x9b   : > { %948 = vadd.xlane.f32.xlu2 %v947_v50  ;;  %857 = vadd.xlane.f32.xlu0 %v856_v51  ;;  %v953_v9 = vsel %vm489_vm0, %v925_v63, 0.0 }
  0x9c   : > { %942 = vadd.xlane.f32.xlu1 %v941_v52  ;;  %v462_v52 = vpack.c.bf16 %v1936_v6, %v1921_v0 }
  0x9e   : > { %1641 = vmatmul.msk.bf16.gmra.mxu0 %vm489_vm0, %v462_v52 }
  0xa3   : > { %866 = vadd.xlane.f32.xlu2 %v865_v60  ;;  %951 = vadd.xlane.f32.xlu0 %v950_v61 }
  0xa4   : > { %860 = vadd.xlane.f32.xlu1 %v859_v62 }
  0xab   : > { %869 = vadd.xlane.f32.xlu2 %v868_v5  ;;  %954 = vadd.xlane.f32.xlu0 %v953_v9 }
  0xac   : > { %863 = vadd.xlane.f32.xlu1 %v862_v10 }
  0xb3   : > { %872 = vadd.xlane.f32.xlu0 %v871_v13 }
  0xbb   : > { %875 = vadd.xlane.f32.xlu0 %v874_v15 }
  0xfe   : > { %v937_v22 = vpop.xlane.xlu0 %936 }
  0xff   : > { %v983_v24 = vmul.f32 %v937_v22, %v1955_v20 }
 0x101   : > { %v999_v26 = vadd.f32 1e-05, %v983_v24 }
 0x103   : > { %1757 = vrsqrt.f32 %v999_v26  ;;  %vm1021_vm3 = vweird.f32 %v999_v26 }
 0x106   : > { %v946_v28 = vpop.xlane.xlu2 %945  ;;  %v855_v29 = vpop.xlane.xlu0 %854 }
 0x107   : > { %v986_v1 = vmul.f32 %v946_v28, %v1955_v20  ;;  %v940_v7 = vpop.xlane.xlu1 %939  ;;  %v894_v30 = vmul.f32 %v1955_v20, %v855_v29 }
 0x108   : > { %v984_v31 = vmul.f32 %v940_v7, %v1955_v20 }
 0x109   : > { %v1758_v32 = vpop.eup %1757  ;;  %v2074_v33 = vadd.f32 1e-05, %v986_v1  ;;  %v2077_v37 = vsub.f32 %v1969_v34, %v894_v30 }
 0x10a   : > { %v1016_v39 = vmul.f32 %v1758_v32, %v999_v26  ;;  %v1000_v40 = vadd.f32 1e-05, %v984_v31  ;;  %vm1022_vm2 = vweird.f32 %v1758_v32 }
 0x10b   : > { %1759 = vrsqrt.f32 %v2074_v33  ;;  %v926_v41 = vmul.f32 %v2077_v37, %v2077_v37  ;;  %vm2103_vm6 = vmor %vm1021_vm3, %vm1022_vm2  ;;  %vm1051_vm10 = vweird.f32 %v2074_v33 }
 0x10c   : > { %v1017_v43 = vmul.f32 %v1758_v32, %v1016_v39  ;;  %1761 = vrsqrt.f32 %v1000_v40  ;;  %vm1031_vm4 = vweird.f32 %v1000_v40 }
 0x10d   : > { %v956_v44 = vsel %vm489_vm0, %v926_v41, 0.0  ;;  %v2134_v41 = vld [vmem:[%s2689_s5] ss:$0 sm:$0xff] }
 0x10e   : > { %v1018_v45 = vmul.f32 0.5, %v1017_v43  ;;  %v949_v46 = vpop.xlane.xlu2 %948  ;;  %957 = vadd.xlane.f32.xlu1 %v956_v44  ;;  %v858_v48 = vpop.xlane.xlu0 %857  ;;  %v877_v44 = vsel %vm489_vm0, %v2056_v18, 0.0 }
 0x10f   : > { %v943_v50 = vpop.xlane.xlu1 %942  ;;  %v895_v51 = vmul.f32 %v1955_v20, %v858_v48  ;;  %v987_v61 = vmul.f32 %v949_v46, %v1955_v20  ;;  %v463_v48 = vpack.c.bf16 %v1942_v8, %v1931_v4  ;;  %v2156_v4 = vld [vmem:[%s2690_s6] ss:$0 sm:$0xff] }
 0x110   : > { %v1019_v53 = vsub.f32 1.5, %v1018_v45  ;;  %v985_v54 = vmul.f32 %v943_v50, %v1955_v20 }
 0x111   : > { %v2087_v55 = vpop.eup %1759  ;;  %v2090_v56 = vsub.f32 %v1995_v47, %v895_v51  ;;  %v2101_v10 = vadd.f32 1e-05, %v987_v61  ;;  %1642 = vmatmul.msk.bf16.gmra.mxu0 %vm489_vm0, %v463_v48 }
 0x112   : > { %v1762_v60 = vpop.eup %1761  ;;  %v2094_v62 = vadd.f32 1e-05, %v985_v54  ;;  %v1020_v5 = vmul.f32 %v1758_v32, %v1019_v53  ;;  %v1046_v0 = vmul.f32 %v2087_v55, %v2074_v33  ;;  %vm1052_vm11 = vweird.f32 %v2087_v55 }
 0x113   : > { %v1026_v63 = vmul.f32 %v1762_v60, %v1000_v40  ;;  %v927_v9 = vmul.f32 %v2090_v56, %v2090_v56  ;;  %vm1032_vm5 = vweird.f32 %v1762_v60  ;;  %vm2192_vm13 = vmor %vm1051_vm10, %vm1052_vm11  ;;  %vm1061_vm1 = vweird.f32 %v2101_v10 }
 0x114   : > { %1763 = vrsqrt.f32 %v2094_v62  ;;  %v1024_v24 = vsel %vm2103_vm6, %v1758_v32, %v1020_v5  ;;  %v1047_v26 = vmul.f32 %v2087_v55, %v1046_v0  ;;  %vm1033_vm7 = vmor %vm1031_vm4, %vm1032_vm5  ;;  %vm1041_vm8 = vweird.f32 %v2094_v62 }
 0x115   : > { %v1027_v6 = vmul.f32 %v1762_v60, %v1026_v63  ;;  %v959_v22 = vsel %vm489_vm0, %v927_v9, 0.0  ;;  %1765 = vrsqrt.f32 %v2101_v10  ;;  %v1175_v31 = vmul.f32 %v1024_v24, %v1959_v25 }
 0x116   : > { %v867_v13 = vpop.xlane.xlu2 %866  ;;  %v952_v15 = vpop.xlane.xlu0 %951  ;;  %960 = vadd.xlane.f32.xlu1 %v959_v22  ;;  %v1048_v40 = vmul.f32 0.5, %v1047_v26 }
 0x117   : > { %v1028_v17 = vmul.f32 0.5, %v1027_v6  ;;  %v898_v19 = vmul.f32 %v1955_v20, %v867_v13  ;;  %v861_v21 = vpop.xlane.xlu1 %860  ;;  %v988_v23 = vmul.f32 %v952_v15, %v1955_v20  ;;  %v1195_v5 = vmul.f32 %v2134_v41, %v1175_v31 }
 0x118   : > { %v896_v27 = vmul.f32 %v1955_v20, %v861_v21  ;;  %v465_v21 = vpack.c.bf16 %v2016_v58, %v1995_v47 }
 0x119   : > { %v1029_v28 = vsub.f32 1.5, %v1028_v17  ;;  %v2115_v29 = vsub.f32 %v2013_v57, %v898_v19  ;;  %v2117_v1 = vadd.f32 1e-05, %v988_v23 }
 0x11a   : > { %v2119_v7 = vpop.eup %1763  ;;  %v2125_v30 = vsub.f32 %v2016_v58, %v896_v27 }
 0x11b   : > { %v1030_v32 = vmul.f32 %v1762_v60, %v1029_v28  ;;  %v1036_v39 = vmul.f32 %v2119_v7, %v2094_v62  ;;  %1767 = vrsqrt.f32 %v2117_v1  ;;  %v930_v43 = vmul.f32 %v2115_v29, %v2115_v29  ;;  %v2158_v8 = vpop.eup %1765  ;;  %v1731_v62 = vld [vmem:[%s2687_s3 + $0x38] sm:$0xff] }
 0x11c   : > { %v928_v46 = vmul.f32 %v2125_v30, %v2125_v30  ;;  %vm1042_vm9 = vweird.f32 %v2119_v7  ;;  %v1056_v23 = vmul.f32 %v2158_v8, %v2101_v10  ;;  %vm1071_vm14 = vweird.f32 %v2117_v1  ;;  %783 = vmatpush.bf16.msra.mxu1 %v1731_v62 }
 0x11d   : > { %v1034_v45 = vsel %vm1033_vm7, %v1762_v60, %v1030_v32  ;;  %v1037_v25 = vmul.f32 %v2119_v7, %v1036_v39  ;;  %v968_v52 = vsel %vm489_vm0, %v930_v43, 0.0  ;;  %vm2179_vm12 = vmor %vm1041_vm8, %vm1042_vm9  ;;  %vm1062_vm2 = vweird.f32 %v2158_v8 }
 0x11e   : > { %v1176_v50 = vmul.f32 %v1034_v45, %v1975_v36  ;;  %v870_v51 = vpop.xlane.xlu2 %869  ;;  %v2148_v53 = vpop.xlane.xlu0 %954  ;;  %969 = vadd.xlane.f32.xlu0 %v968_v52  ;;  %v962_v61 = vsel %vm489_vm0, %v928_v46, 0.0  ;;  %v1049_v36 = vsub.f32 1.5, %v1048_v40  ;;  %878 = vadd.xlane.f32.xlu1 %v877_v44  ;;  %v1057_v45 = vmul.f32 %v2158_v8, %v1056_v23  ;;  %vm1063_vm4 = vmor %vm1061_vm1, %vm1062_vm2 }
 0x11f   : > { %v1038_v54 = vmul.f32 0.5, %v1037_v25  ;;  %v899_v60 = vmul.f32 %v1955_v20, %v870_v51  ;;  %v864_v63 = vpop.xlane.xlu1 %863  ;;  %963 = vadd.xlane.f32.xlu2 %v962_v61  ;;  %v523_v23 = vpop.f32.mrf.mxu0 }
 0x120   : > { %v897_v0 = vmul.f32 %v1955_v20, %v864_v63  ;;  %v1196_v6 = vmul.f32 %v2134_v41, %v1176_v50  ;;  %v1050_v22 = vmul.f32 %v2087_v55, %v1049_v36  ;;  %v1058_v51 = vmul.f32 0.5, %v1057_v45 }
 0x121   : > { %v2163_v9 = vpop.eup %1767  ;;  %v1039_v13 = vsub.f32 1.5, %v1038_v54  ;;  %v2166_v15 = vsub.f32 %v2029_v2, %v899_v60  ;;  %v1215_v2 = vadd.f32 %v2156_v4, %v1195_v5  ;;  %v464_v54 = vpack.c.bf16 %v1969_v34, %v1951_v12 }
 0x122   : > { %v1066_v16 = vmul.f32 %v2163_v9, %v2117_v1  ;;  %v2174_v17 = vsub.f32 %v2032_v3, %v897_v0  ;;  %v1216_v33 = vadd.f32 %v2156_v4, %v1196_v6  ;;  %v1054_v44 = vsel %vm2192_vm13, %v2087_v55, %v1050_v22 }
 0x123   : > { %v1040_v19 = vmul.f32 %v2119_v7, %v1039_v13  ;;  %v931_v26 = vmul.f32 %v2166_v15, %v2166_v15  ;;  %v1178_v48 = vmul.f32 %v1054_v44, %v1972_v35  ;;  %v1059_v63 = vsub.f32 1.5, %v1058_v51  ;;  %1643 = vmatmul.msk.bf16.gmra.mxu0 %vm489_vm0, %v464_v54 }
 0x124   : > { %v929_v24 = vmul.f32 %v2174_v17, %v2174_v17  ;;  %v1231_v27 = vpack.c.bf16 %v1216_v33, %v1215_v2  ;;  %v1067_v31 = vmul.f32 %v2163_v9, %v1066_v16  ;;  %vm1072_vm15 = vweird.f32 %v2163_v9 }
 0x125   : > { %v1044_v28 = vsel %vm2179_vm12, %v2119_v7, %v1040_v19  ;;  %v971_v39 = vsel %vm489_vm0, %v931_v26, 0.0  ;;  %vm1073_vm3 = vmor %vm1071_vm14, %vm1072_vm15  ;;  %v1060_v36 = vmul.f32 %v2158_v8, %v1059_v63 }
 0x126   : > { %v965_v32 = vsel %vm489_vm0, %v929_v24, 0.0  ;;  %v873_v40 = vpop.xlane.xlu0 %872  ;;  %1688 = vmatmul.msk.bf16.vlgmr.msrb.gmra.mxu2 %vm489_vm0, %v1231_v27  ;;  %972 = vadd.xlane.f32.xlu1 %v971_v39  ;;  %v1177_v7 = vmul.f32 %v1044_v28, %v1987_v42  ;;  %v1068_v46 = vmul.f32 0.5, %v1067_v31  ;;  %v2258_v28 = vpop.f32.mrf.mxu2  ;;  %v1730_v31 = vld [vmem:[%s2687_s3 + $0x30] sm:$0xff] }
 0x127   : > { %v900_v43 = vmul.f32 %v1955_v20, %v873_v40  ;;  %966 = vadd.xlane.f32.xlu2 %v965_v32  ;;  %v1064_v10 = vsel %vm1063_vm4, %v2158_v8, %v1060_v36  ;;  %v525_v32 = vpop.f32.mrf.mxu0  ;;  %784 = vmatpush.bf16.msra.mxu1 %v1730_v31 }
 0x128   : > { %v1197_v55 = vmul.f32 %v2134_v41, %v1177_v7  ;;  %v1069_v60 = vsub.f32 1.5, %v1068_v46  ;;  %v1179_v16 = vmul.f32 %v1064_v10, %v1978_v38  ;;  %v989_v38 = vmul.f32 %v2148_v53, %v1955_v20  ;;  %v1729_v7 = vld [vmem:[%s2687_s3 + $0x28] sm:$0xff] }
 0x129   : > { %v2210_v25 = vsub.f32 %v2040_v11, %v900_v43  ;;  %v1198_v11 = vmul.f32 %v2134_v41, %v1178_v48 }
 0x12a   : > { %v1217_v5 = vadd.f32 %v2156_v4, %v1197_v55  ;;  %v1070_v12 = vmul.f32 %v2163_v9, %v1069_v60  ;;  %v1199_v2 = vmul.f32 %v2134_v41, %v1179_v16  ;;  %v1005_v47 = vadd.f32 1e-05, %v989_v38 }
 0x12b   : > { %v932_v50 = vmul.f32 %v2210_v25, %v2210_v25  ;;  %v1218_v34 = vadd.f32 %v2156_v4, %v1198_v11  ;;  %785 = vmatpush.bf16.msra.mxu1 %v1729_v7  ;;  %v1728_v11 = vld [vmem:[%s2687_s3 + $0x20] sm:$0xff] }
 0x12c   : > { %v1074_v6 = vsel %vm1073_vm3, %v2163_v9, %v1070_v12  ;;  %v1219_v9 = vadd.f32 %v2156_v4, %v1199_v2  ;;  %1769 = vrsqrt.f32 %v1005_v47  ;;  %vm1081_vm5 = vweird.f32 %v1005_v47 }
 0x12d   : > { %v974_v52 = vsel %vm489_vm0, %v932_v50, 0.0  ;;  %v1180_v13 = vmul.f32 %v1074_v6, %v2000_v49  ;;  %v466_v49 = vpack.c.bf16 %v2013_v57, %v2032_v3  ;;  %v2263_v57 = vld [vmem:[%s2686_s2] ss:$0 sm:$0xff]  ;;  %v1727_v6 = vld [vmem:[%s2687_s3 + $0x18] sm:$0xff] }
 0x12e   : > { %v876_v61 = vpop.xlane.xlu0 %875  ;;  %v2269_v39 = vadd.f32 %v2263_v57, %v523_v23  ;;  %v2272_v40 = vadd.f32 %v2263_v57, %v525_v32  ;;  %v2284_v55 = vpop.f32.mrf.mxu2 }
 0x12f   : > { %v901_v42 = vmul.f32 %v1955_v20, %v876_v61  ;;  %975 = vadd.xlane.f32.xlu2 %v974_v52  ;;  %v1200_v19 = vmul.f32 %v2134_v41, %v1180_v13  ;;  %v528_v12 = vpop.f32.mrf.mxu0  ;;  %786 = vmatpush.bf16.msra.mxu1 %v1728_v11 }
 0x130   : > { %v563_v44 = vmul.f32 %v2269_v39, %v2269_v39  ;;  %v564_v45 = vmul.f32 %v2272_v40, %v2272_v40 }
 0x131   : > { %v2224_v35 = vsub.f32 %v2045_v14, %v901_v42  ;;  %v1232_v14 = vpack.c.bf16 %v1218_v34, %v1217_v5  ;;  %v1220_v33 = vadd.f32 %v2156_v4, %v1200_v19 }
 0x132   : > { %v1770_v58 = vpop.eup %1769  ;;  %v579_v48 = vmul.f32 %v563_v44, %v2269_v39  ;;  %v580_v50 = vmul.f32 %v564_v45, %v2272_v40  ;;  %v1725_v44 = vld [vmem:[%s2687_s3 + $0x8] sm:$0xff] }
 0x133   : > { %v933_v1 = vmul.f32 %v2224_v35, %v2224_v35  ;;  %1644 = vmatmul.msk.bf16.gmra.mxu0 %vm489_vm0, %v465_v21  ;;  %v1233_v22 = vpack.c.bf16 %v1220_v33, %v1219_v9  ;;  %v1076_v8 = vmul.f32 %v1770_v58, %v1005_v47  ;;  %vm1082_vm6 = vweird.f32 %v1770_v58  ;;  %787 = vmatpush.bf16.msra.mxu1 %v1727_v6 }
 0x134   : > { %v595_v61 = vmul.f32 0.044715, %v579_v48  ;;  %v596_v42 = vmul.f32 0.044715, %v580_v50  ;;  %vm2289_vm7 = vmor %vm1081_vm5, %vm1082_vm6 }
 0x135   : > { %v977_v0 = vsel %vm489_vm0, %v933_v1, 0.0  ;;  %v1077_v24 = vmul.f32 %v1770_v58, %v1076_v8  ;;  %v1734_v8 = vld [vmem:[%s2693_s9] sm:$0xff] }
 0x136   : > { %978 = vadd.xlane.f32.xlu0 %v977_v0  ;;  %1689 = vmatmul.msk.bf16.gmra.mxu2 %vm489_vm0, %v1232_v14  ;;  %v611_v1 = vadd.f32 %v595_v61, %v2269_v39  ;;  %v612_v36 = vadd.f32 %v596_v42, %v2272_v40 }
 0x137   : > { %v1078_v53 = vmul.f32 0.5, %v1077_v24  ;;  %v530_v62 = vpop.f32.mrf.mxu0  ;;  %1384 = vmatpush.bf16.msrb.mxu0 %v1734_v8  ;;  %1738 = vmatpush.bf16.msra.mxu3 %v1734_v8 }
 0x138   : > { %v627_v10 = vmul.f32 0.7978846, %v611_v1  ;;  %v628_v16 = vmul.f32 0.7978846, %v612_v36 }
 0x139   : > { %v1079_v43 = vsub.f32 1.5, %v1078_v53 }
 0x13b   : > { %v1080_v54 = vmul.f32 %v1770_v58, %v1079_v43  ;;  %v2335_v43 = vadd.f32 %v2263_v57, %v528_v12 }
 0x13d   : > { %v1084_v14 = vsel %vm2289_vm7, %v1770_v58, %v1080_v54  ;;  %v1726_v58 = vld [vmem:[%s2687_s3 + $0x10] sm:$0xff]  ;;  %v565_v12 = vmul.f32 %v2335_v43, %v2335_v43 }
 0x13e   : > { %v1181_v9 = vmul.f32 %v1084_v14, %v2019_v59  ;;  %788 = vmatpush.bf16.msra.mxu1 %v1726_v58 }
 0x140   : > { %v1201_v32 = vmul.f32 %v2134_v41, %v1181_v9 }
 0x142   : > { %789 = vmatpush.bf16.msra.mxu1 %v1725_v44  ;;  %v1221_v63 = vadd.f32 %v2156_v4, %v1201_v32 }
 0x143   : > { %1645 = vmatmul.msk.bf16.gmra.mxu0 %vm489_vm0, %v466_v49 }
 0x146   : > { %1690 = vmatmul.msk.bf16.gmra.mxu2 %vm489_vm0, %v1233_v22 }
 0x181   : > { %v958_v26 = vpop.xlane.xlu1 %957 }
 0x182   : > { %v990_v27 = vmul.f32 %v958_v26, %v1955_v20  ;;  %v2323_v26 = vpop.f32.mrf.mxu2 }
 0x184   : > { %v1006_v3 = vadd.f32 1e-05, %v990_v27 }
 0x186   : > { %1771 = vrsqrt.f32 %v1006_v3  ;;  %vm1091_vm9 = vweird.f32 %v1006_v3 }
 0x189   : > { %v961_v46 = vpop.xlane.xlu1 %960 }
 0x18a   : > { %v991_v52 = vmul.f32 %v961_v46, %v1955_v20 }
 0x18c   : > { %v1772_v51 = vpop.eup %1771  ;;  %v2293_v5 = vadd.f32 1e-05, %v991_v52 }
 0x18d   : > { %v1086_v60 = vmul.f32 %v1772_v51, %v1006_v3  ;;  %vm1092_vm8 = vweird.f32 %v1772_v51 }
 0x18e   : > { %1773 = vrsqrt.f32 %v2293_v5  ;;  %vm1093_vm10 = vmor %vm1091_vm9, %vm1092_vm8  ;;  %vm1101_vm12 = vweird.f32 %v2293_v5  ;;  %vm1352_vm8 = vcmask 130048  }
 0x18f   : > { %v1087_v34 = vmul.f32 %v1772_v51, %v1086_v60  ;;  %1775 = vtanh.f32 %v627_v10  ;;  %v2345_v60 = vadd.f32 %v2263_v57, %v530_v62 }
 0x190   : > { %1777 = vtanh.f32 %v628_v16 }
 0x191   : > { %v1088_v0 = vmul.f32 0.5, %v1087_v34  ;;  %v970_v13 = vpop.xlane.xlu0 %969  ;;  %v879_v2 = vpop.xlane.xlu1 %878  ;;  %v1724_v34 = vld [vmem:[%s2687_s3] sm:$0xff] }
 0x192   : > { %v964_v21 = vpop.xlane.xlu2 %963  ;;  %v994_v33 = vmul.f32 %v970_v13, %v1955_v20  ;;  %v902_v49 = vmul.f32 %v1955_v20, %v879_v2  ;;  %790 = vmatpush.bf16.msra.mxu1 %v1724_v34  ;;  %v566_v2 = vmul.f32 %v2345_v60, %v2345_v60 }
 0x193   : > { %v1089_v19 = vsub.f32 1.5, %v1088_v0  ;;  %v992_v22 = vmul.f32 %v964_v21, %v1955_v20  ;;  %v533_v0 = vpop.f32.mrf.mxu0  ;;  %v2364_v21 = vpop.f32.mrf.mxu2 }
 0x194   : > { %v2307_v47 = vadd.f32 1e-05, %v994_v33  ;;  %v2315_v23 = vpop.eup %1773  ;;  %v2321_v24 = vsub.f32 %v2056_v18, %v902_v49 }
 0x195   : > { %v1090_v38 = vmul.f32 %v1772_v51, %v1089_v19  ;;  %v2318_v59 = vadd.f32 1e-05, %v992_v22  ;;  %v1096_v3 = vmul.f32 %v2315_v23, %v2293_v5  ;;  %vm1102_vm11 = vweird.f32 %v2315_v23 }
 0x196   : > { %1779 = vrsqrt.f32 %v2307_v47  ;;  %v934_v31 = vmul.f32 %v2321_v24, %v2321_v24  ;;  %v581_v22 = vmul.f32 %v565_v12, %v2335_v43  ;;  %vm2375_vm13 = vmor %vm1101_vm12, %vm1102_vm11  ;;  %v2382_v5 = vadd.f32 %v2263_v57, %v533_v0 }
 0x197   : > { %v1094_v27 = vsel %vm1093_vm10, %v1772_v51, %v1090_v38  ;;  %1781 = vrsqrt.f32 %v2318_v59  ;;  %v1097_v18 = vmul.f32 %v2315_v23, %v1096_v3  ;;  %vm1111_vm14 = vweird.f32 %v2318_v59 }
 0x198   : > { %v1182_v53 = vmul.f32 %v1094_v27, %v2077_v37  ;;  %v1776_v37 = vpop.eup %1775  ;;  %v980_v48 = vsel %vm489_vm0, %v934_v31, 0.0  ;;  %v597_v32 = vmul.f32 0.044715, %v581_v22  ;;  %v567_v44 = vmul.f32 %v2382_v5, %v2382_v5 }
 0x199   : > { %v1098_v7 = vmul.f32 0.5, %v1097_v18  ;;  %v973_v50 = vpop.xlane.xlu1 %972  ;;  %v1778_v51 = vpop.eup %1777  ;;  %981 = vadd.xlane.f32.xlu1 %v980_v48  ;;  %v659_v6 = vadd.f32 1.0, %v1776_v37  ;;  %v582_v18 = vmul.f32 %v566_v2, %v2345_v60  ;;  %vm1131_vm2 = vweird.f32 %v2307_v47 }
 0x19a   : > { %v1202_v45 = vmul.f32 %v2134_v41, %v1182_v53  ;;  %v967_v46 = vpop.xlane.xlu2 %966  ;;  %v995_v11 = vmul.f32 %v973_v50, %v1955_v20  ;;  %v660_v19 = vadd.f32 1.0, %v1778_v51 }
 0x19b   : > { %v993_v52 = vmul.f32 %v967_v46, %v1955_v20  ;;  %v1099_v42 = vsub.f32 1.5, %v1098_v7  ;;  %v675_v27 = vmul.f32 0.5, %v659_v6  ;;  %v535_v46 = vpop.f32.mrf.mxu0 }
 0x19c   : > { %v1222_v54 = vadd.f32 %v2156_v4, %v1202_v45  ;;  %v2347_v61 = vpop.eup %1779  ;;  %v2369_v9 = vadd.f32 1e-05, %v995_v11  ;;  %v676_v3 = vmul.f32 0.5, %v660_v19  ;;  %v613_v11 = vadd.f32 %v597_v32, %v2335_v43 }
 0x19d   : > { %v1782_v1 = vpop.eup %1781  ;;  %v1126_v36 = vmul.f32 %v2347_v61, %v2307_v47  ;;  %v2359_v14 = vadd.f32 1e-05, %v993_v52  ;;  %v1100_v10 = vmul.f32 %v2315_v23, %v1099_v42  ;;  %v691_v51 = vmul.f32 %v675_v27, %v2269_v39  ;;  %v2446_v27 = vld [vmem:[%s2692_s8] ss:$0 sm:$0xff] }
 0x19e   : > { %v1106_v13 = vmul.f32 %v1782_v1, %v2318_v59  ;;  %v1234_v16 = vpack.c.bf16 %v1222_v54, %v1221_v63  ;;  %vm1112_vm15 = vweird.f32 %v1782_v1  ;;  %v692_v52 = vmul.f32 %v676_v3, %v2272_v40 }
 0x19f   : > { %1783 = vrsqrt.f32 %v2359_v14  ;;  %v1127_v38 = vmul.f32 %v2347_v61, %v1126_v36  ;;  %v1104_v58 = vsel %vm2375_vm13, %v2315_v23, %v1100_v10  ;;  %vm1113_vm1 = vmor %vm1111_vm14, %vm1112_vm15  ;;  %v598_v54 = vmul.f32 0.044715, %v582_v18 }
 0x1a0   : > { %v1107_v33 = vmul.f32 %v1782_v1, %v1106_v13  ;;  %1691 = vmatmul.msk.bf16.gmra.mxu2 %vm489_vm0, %v1234_v16  ;;  %1785 = vrsqrt.f32 %v2369_v9  ;;  %v1183_v37 = vmul.f32 %v1104_v58, %v2090_v56  ;;  %v583_v56 = vmul.f32 %v567_v44, %v2382_v5 }
 0x1a1   : > { %v1128_v23 = vmul.f32 0.5, %v1127_v38  ;;  %vm1121_vm3 = vweird.f32 %v2359_v14  ;;  %vm1132_vm5 = vweird.f32 %v2347_v61  ;;  %v2419_v13 = vadd.f32 %v2263_v57, %v535_v46 }
 0x1a2   : > { %v1108_v8 = vmul.f32 0.5, %v1107_v33  ;;  %v976_v62 = vpop.xlane.xlu2 %975  ;;  %v1203_v39 = vmul.f32 %v2134_v41, %v1183_v37  ;;  %v599_v6 = vmul.f32 0.044715, %v583_v56  ;;  %v629_v16 = vmul.f32 0.7978846, %v613_v11  ;;  %vm2436_vm7 = vmor %vm1131_vm2, %vm1132_vm5 }
 0x1a3   : > { %v996_v53 = vmul.f32 %v976_v62, %v1955_v20  ;;  %v1129_v12 = vsub.f32 1.5, %v1128_v23  ;;  %v538_v38 = vpop.f32.mrf.mxu0  ;;  %v568_v3 = vmul.f32 %v2419_v13, %v2419_v13  ;;  %vm1141_vm9 = vweird.f32 %v2369_v9 }
 0x1a4   : > { %v1109_v31 = vsub.f32 1.5, %v1108_v8  ;;  %v1223_v22 = vadd.f32 %v2156_v4, %v1203_v39  ;;  %v615_v47 = vadd.f32 %v599_v6, %v2382_v5  ;;  %v2452_v18 = vadd.f32 %v2263_v57, %v538_v38 }
 0x1a5   : > { %v2392_v45 = vpop.eup %1783  ;;  %v2398_v7 = vadd.f32 1e-05, %v996_v53  ;;  %v584_v37 = vmul.f32 %v568_v3, %v2419_v13 }
 0x1a6   : > { %v1110_v48 = vmul.f32 %v1782_v1, %v1109_v31  ;;  %v1116_v50 = vmul.f32 %v2392_v45, %v2359_v14  ;;  %v2411_v36 = vpop.eup %1785  ;;  %vm1122_vm4 = vweird.f32 %v2392_v45  ;;  %v1130_v14 = vmul.f32 %v2347_v61, %v1129_v12 }
 0x1a7   : > { %1787 = vrsqrt.f32 %v2398_v7  ;;  %vm2424_vm6 = vmor %vm1121_vm3, %vm1122_vm4  ;;  %v1136_v33 = vmul.f32 %v2411_v36, %v2369_v9  ;;  %v631_v56 = vmul.f32 0.7978846, %v615_v47  ;;  %vm1151_vm10 = vweird.f32 %v2398_v7 }
 0x1a8   : > { %v1114_v42 = vsel %vm1113_vm1, %v1782_v1, %v1110_v48  ;;  %v1117_v59 = vmul.f32 %v2392_v45, %v1116_v50  ;;  %v707_v1 = vpack.c.bf16 %v692_v52, %v691_v51  ;;  %1789 = vtanh.f32 %v629_v16 }
 0x1a9   : > { %v1184_v63 = vmul.f32 %v1114_v42, %v2125_v30  ;;  %v1292_v34 = vpop.f32.mrf.mxu2  ;;  %v614_v30 = vadd.f32 %v598_v54, %v2345_v60  ;;  %v1134_v23 = vsel %vm2436_vm7, %v2347_v61, %v1130_v14  ;;  %v1137_v46 = vmul.f32 %v2411_v36, %v1136_v33 }
 0x1aa   : > { %v1118_v40 = vmul.f32 0.5, %v1117_v59  ;;  %791 = vmatmul.bf16.vlgmr.msra.gmra.mxu1 %v707_v1  ;;  %v569_v50 = vmul.f32 %v2452_v18, %v2452_v18  ;;  %v600_v52 = vmul.f32 0.044715, %v584_v37  ;;  %v1186_v61 = vmul.f32 %v1134_v23, %v2115_v29 }
 0x1ab   : > { %v1204_v0 = vmul.f32 %v2134_v41, %v1184_v63  ;;  %v630_v31 = vmul.f32 0.7978846, %v614_v30  ;;  %v1138_v11 = vmul.f32 0.5, %v1137_v46  ;;  %v540_v39 = vpop.f32.mrf.mxu0  ;;  %vm1142_vm12 = vweird.f32 %v2411_v36 }
 0x1ac   : > { %v1119_v10 = vsub.f32 1.5, %v1118_v40  ;;  %v616_v63 = vadd.f32 %v600_v52, %v2419_v13  ;;  %v585_v12 = vmul.f32 %v569_v50, %v2452_v18  ;;  %v1206_v30 = vmul.f32 %v2134_v41, %v1186_v61  ;;  %vm2498_vm14 = vmor %vm1141_vm9, %vm1142_vm12 }
 0x1ad   : > { %v2421_v19 = vpop.eup %1787  ;;  %v1224_v49 = vadd.f32 %v2156_v4, %v1204_v0  ;;  %1791 = vtanh.f32 %v630_v31  ;;  %v1139_v16 = vsub.f32 1.5, %v1138_v11 }
 0x1ae   : > { %v1120_v8 = vmul.f32 %v2392_v45, %v1119_v10  ;;  %v1146_v62 = vmul.f32 %v2421_v19, %v2398_v7  ;;  %v1790_v40 = vpop.eup %1789  ;;  %1793 = vtanh.f32 %v631_v56  ;;  %v601_v2 = vmul.f32 0.044715, %v585_v12 }
 0x1af   : > { %v1235_v53 = vpack.c.bf16 %v1224_v49, %v1223_v22  ;;  %v661_v29 = vadd.f32 1.0, %v1790_v40  ;;  %v632_v22 = vmul.f32 0.7978846, %v616_v63  ;;  %vm1152_vm11 = vweird.f32 %v2421_v19 }
 0x1b0   : > { %v1124_v32 = vsel %vm2424_vm6, %v2392_v45, %v1120_v8  ;;  %v1147_v44 = vmul.f32 %v2421_v19, %v1146_v62  ;;  %v1293_v45 = vadd.f32 %v2446_v27, %v1292_v34  ;;  %v2474_v34 = vadd.f32 %v2263_v57, %v540_v39  ;;  %vm2490_vm13 = vmor %vm1151_vm10, %vm1152_vm11 }
 0x1b1   : > { %v1294_v48 = vpop.f32.mrf.mxu2  ;;  %1692 = vmatmul.msk.bf16.gmra.mxu2 %vm489_vm0, %v1235_v53  ;;  %v1185_v54 = vmul.f32 %v1124_v32, %v2174_v17  ;;  %v677_v33 = vmul.f32 0.5, %v661_v29  ;;  %1795 = vtanh.f32 %v632_v22  ;;  %v1140_v7 = vmul.f32 %v2411_v36, %v1139_v16 }
 0x1b2   : > { %v1295_v51 = vadd.f32 %v2446_v27, %v1294_v48  ;;  %v1148_v42 = vmul.f32 0.5, %v1147_v44  ;;  %v570_v10 = vmul.f32 %v2474_v34, %v2474_v34  ;;  %v1226_v32 = vadd.f32 %v2156_v4, %v1206_v30 }
 0x1b3   : > { %v1792_v1 = vpop.eup %1791  ;;  %v1205_v17 = vmul.f32 %v2134_v41, %v1185_v54  ;;  %v693_v8 = vmul.f32 %v677_v33, %v2335_v43  ;;  %v617_v44 = vadd.f32 %v601_v2, %v2452_v18  ;;  %v543_v37 = vpop.f32.mrf.mxu0  ;;  %v1144_v9 = vsel %vm2498_vm14, %v2411_v36, %v1140_v7 }
 0x1b4   : > { %v1332_v59 = vpack.c.bf16 %v1295_v51, %v1293_v45  ;;  %v1149_v0 = vsub.f32 1.5, %v1148_v42  ;;  %v662_v6 = vadd.f32 1.0, %v1792_v1  ;;  %v586_v38 = vmul.f32 %v570_v10, %v2474_v34  ;;  %v1794_v47 = vpop.eup %1793 }
 0x1b5   : > { %v1225_v58 = vadd.f32 %v2156_v4, %v1205_v17  ;;  %v2503_v23 = vadd.f32 %v2263_v57, %v543_v37  ;;  %v663_v45 = vadd.f32 1.0, %v1794_v47  ;;  %v633_v54 = vmul.f32 0.7978846, %v617_v44 }
 0x1b6   : > { %1700 = vmatmul.msk.bf16.vlgmr.msrb.gmra.mxu0 %vm1352_vm8, %v1332_v59  ;;  %v678_v49 = vmul.f32 0.5, %v662_v6  ;;  %v1150_v62 = vmul.f32 %v2421_v19, %v1149_v0  ;;  %v602_v53 = vmul.f32 0.044715, %v586_v38  ;;  %v1187_v36 = vmul.f32 %v1144_v9, %v2166_v15 }
 0x1b7   : > { %v1236_v46 = vpack.c.bf16 %v1226_v32, %v1225_v58  ;;  %v1796_v51 = vpop.eup %1795  ;;  %v571_v42 = vmul.f32 %v2503_v23, %v2503_v23  ;;  %v679_v12 = vmul.f32 0.5, %v663_v45  ;;  %1797 = vtanh.f32 %v633_v54 }
 0x1b8   : > { %v694_v3 = vmul.f32 %v678_v49, %v2345_v60  ;;  %v618_v48 = vadd.f32 %v602_v53, %v2474_v34  ;;  %v1154_v50 = vsel %vm2490_vm13, %v2421_v19, %v1150_v62  ;;  %v664_v59 = vadd.f32 1.0, %v1796_v51 }
 0x1b9   : > { %v1297_v14 = vpop.f32.mrf.mxu2  ;;  %v1188_v19 = vmul.f32 %v1154_v50, %v2210_v25  ;;  %v587_v1 = vmul.f32 %v571_v42, %v2503_v23  ;;  %v695_v25 = vmul.f32 %v679_v12, %v2382_v5  ;;  %v1207_v6 = vmul.f32 %v2134_v41, %v1187_v36 }
 0x1ba   : > { %v708_v60 = vpack.c.bf16 %v694_v3, %v693_v8  ;;  %v1298_v56 = vadd.f32 %v2446_v27, %v1297_v14  ;;  %v634_v11 = vmul.f32 0.7978846, %v618_v48  ;;  %v680_v39 = vmul.f32 0.5, %v664_v59 }
 0x1bb   : > { %v545_v40 = vpop.f32.mrf.mxu0  ;;  %v1208_v29 = vmul.f32 %v2134_v41, %v1188_v19  ;;  %v603_v10 = vmul.f32 0.044715, %v587_v1  ;;  %v1227_v38 = vadd.f32 %v2156_v4, %v1207_v6  ;;  %v559_v6 = vadd.f32 %v2263_v57, %v2323_v26 }
 0x1bc   : > { %796 = vmatmul.bf16.gmra.mxu1 %v708_v60  ;;  %v2522_v17 = vadd.f32 %v2263_v57, %v545_v40  ;;  %1799 = vtanh.f32 %v634_v11  ;;  %v696_v0 = vmul.f32 %v680_v39, %v2419_v13 }
 0x1bd   : > { %v1228_v14 = vadd.f32 %v2156_v4, %v1208_v29  ;;  %v1798_v2 = vpop.eup %1797  ;;  %v619_v13 = vadd.f32 %v603_v10, %v2503_v23  ;;  %v561_v10 = vadd.f32 %v2263_v57, %v2364_v21 }
 0x1be   : > { %v572_v30 = vmul.f32 %v2522_v17, %v2522_v17  ;;  %v709_v33 = vpack.c.bf16 %v696_v0, %v695_v25  ;;  %v665_v62 = vadd.f32 1.0, %v1798_v2 }
 0x1bf   : > { %v1237_v8 = vpack.c.bf16 %v1228_v14, %v1227_v38  ;;  %v635_v31 = vmul.f32 0.7978846, %v619_v13  ;;  %v578_v38 = vmul.f32 %v561_v10, %v561_v10 }
 0x1c0   : > { %v588_v16 = vmul.f32 %v572_v30, %v2522_v17  ;;  %v681_v37 = vmul.f32 0.5, %v665_v62 }
 0x1c1   : > { %v1299_v52 = vpop.f32.mrf.mxu2  ;;  %1693 = vmatmul.msk.bf16.gmra.mxu2 %vm489_vm0, %v1236_v46  ;;  %1801 = vtanh.f32 %v635_v31 }
 0x1c2   : > { %v1300_v61 = vadd.f32 %v2446_v27, %v1299_v52  ;;  %v604_v22 = vmul.f32 0.044715, %v588_v16  ;;  %v1800_v49 = vpop.eup %1799  ;;  %v697_v50 = vmul.f32 %v681_v37, %v2452_v18 }
 0x1c3   : > { %v548_v5 = vpop.f32.mrf.mxu0  ;;  %v666_v3 = vadd.f32 1.0, %v1800_v49  ;;  %v577_v49 = vmul.f32 %v559_v6, %v559_v6 }
 0x1c4   : > { %v1333_v63 = vpack.c.bf16 %v1300_v61, %v1298_v56  ;;  %v2535_v58 = vadd.f32 %v2263_v57, %v548_v5  ;;  %v620_v41 = vadd.f32 %v604_v22, %v2522_v17  ;;  %v554_v56 = vadd.f32 %v2263_v57, %v2258_v28 }
 0x1c5   : > { %v682_v43 = vmul.f32 0.5, %v666_v3  ;;  %v556_v61 = vadd.f32 %v2263_v57, %v2284_v55  ;;  %v979_v3 = vpop.xlane.xlu0 %978 }
 0x1c6   : > { %1701 = vmatmul.msk.bf16.gmra.mxu0 %vm1352_vm8, %v1333_v63  ;;  %v573_v4 = vmul.f32 %v2535_v58, %v2535_v58  ;;  %v636_v32 = vmul.f32 0.7978846, %v620_v41  ;;  %v575_v12 = vmul.f32 %v554_v56, %v554_v56  ;;  %v594_v41 = vmul.f32 %v578_v38, %v561_v10 }
 0x1c7   : > { %v698_v45 = vmul.f32 %v682_v43, %v2474_v34  ;;  %v1802_v54 = vpop.eup %1801  ;;  %v576_v18 = vmul.f32 %v556_v61, %v556_v61  ;;  %v997_v31 = vmul.f32 %v979_v3, %v1955_v20 }
 0x1c8   : > { %v589_v46 = vmul.f32 %v573_v4, %v2535_v58  ;;  %1803 = vtanh.f32 %v636_v32  ;;  %v667_v34 = vadd.f32 1.0, %v1802_v54  ;;  %v591_v1 = vmul.f32 %v575_v12, %v554_v56 }
 0x1c9   : > { %v1302_v15 = vpop.f32.mrf.mxu2  ;;  %v710_v42 = vpack.c.bf16 %v698_v45, %v697_v50  ;;  %v592_v29 = vmul.f32 %v576_v18, %v556_v61  ;;  %v1013_v45 = vadd.f32 1e-05, %v997_v31 }
 0x1ca   : > { %v1303_v47 = vadd.f32 %v2446_v27, %v1302_v15  ;;  %v605_v9 = vmul.f32 0.044715, %v589_v46  ;;  %v683_v25 = vmul.f32 0.5, %v667_v34  ;;  %v607_v55 = vmul.f32 0.044715, %v591_v1 }
 0x1cb   : > { %v550_v60 = vpop.f32.mrf.mxu0  ;;  %v608_v0 = vmul.f32 0.044715, %v592_v29  ;;  %vm1161_vm15 = vweird.f32 %v1013_v45 }
 0x1cc   : > { %801 = vmatmul.bf16.gmra.mxu1 %v709_v33  ;;  %v551_v48 = vadd.f32 %v2263_v57, %v550_v60  ;;  %v621_v11 = vadd.f32 %v605_v9, %v2535_v58  ;;  %v699_v30 = vmul.f32 %v683_v25, %v2503_v23  ;;  %v623_v14 = vadd.f32 %v607_v55, %v554_v56 }
 0x1cd   : > { %v624_v2 = vadd.f32 %v608_v0, %v556_v61 }
 0x1ce   : > { %v574_v51 = vmul.f32 %v551_v48, %v551_v48  ;;  %v1804_v19 = vpop.eup %1803  ;;  %v637_v36 = vmul.f32 0.7978846, %v621_v11 }
 0x1cf   : > { %v668_v39 = vadd.f32 1.0, %v1804_v19  ;;  %v640_v23 = vmul.f32 0.7978846, %v624_v2 }
 0x1d0   : > { %v590_v52 = vmul.f32 %v574_v51, %v551_v48  ;;  %1805 = vtanh.f32 %v637_v36 }
 0x1d1   : > { %v1304_v53 = vpop.f32.mrf.mxu2  ;;  %1694 = vmatmul.msk.bf16.gmra.mxu2 %vm489_vm0, %v1237_v8  ;;  %v684_v28 = vmul.f32 0.5, %v668_v39  ;;  %v639_v8 = vmul.f32 0.7978846, %v623_v14 }
 0x1d2   : > { %v1305_v7 = vadd.f32 %v2446_v27, %v1304_v53  ;;  %v606_v59 = vmul.f32 0.044715, %v590_v52  ;;  %v610_v53 = vmul.f32 0.044715, %v594_v41 }
 0x1d3   : > { %v700_v15 = vmul.f32 %v684_v28, %v2522_v17  ;;  %v593_v17 = vmul.f32 %v577_v49, %v559_v6 }
 0x1d4   : > { %v1334_v44 = vpack.c.bf16 %v1305_v7, %v1303_v47  ;;  %v622_v63 = vadd.f32 %v606_v59, %v551_v48  ;;  %v626_v60 = vadd.f32 %v610_v53, %v561_v10 }
 0x1d5   : > { %v711_v33 = vpack.c.bf16 %v700_v15, %v699_v30  ;;  %v609_v21 = vmul.f32 0.044715, %v593_v17 }
 0x1d6   : > { %1702 = vmatmul.msk.bf16.gmra.mxu0 %vm1352_vm8, %v1334_v44  ;;  %v638_v40 = vmul.f32 0.7978846, %v622_v63  ;;  %v1806_v16 = vpop.eup %1805 }
 0x1d7   : > { %v669_v5 = vadd.f32 1.0, %v1806_v16  ;;  %v625_v43 = vadd.f32 %v609_v21, %v559_v6 }
 0x1d8   : > { %1807 = vtanh.f32 %v638_v40 }
 0x1d9   : > { %1809 = vtanh.f32 %v639_v8  ;;  %v685_v26 = vmul.f32 0.5, %v669_v5  ;;  %v641_v54 = vmul.f32 0.7978846, %v625_v43  ;;  %v1822_v5 = vld [vmem:[%s2690_s6] ss:$0 sm:$0xff] }
 0x1da   : > { %1811 = vtanh.f32 %v640_v23 }
 0x1db   : > { %v701_v47 = vmul.f32 %v685_v26, %v2535_v58  ;;  %1813 = vrsqrt.f32 %v1013_v45 }
 0x1dc   : > { %806 = vmatmul.bf16.gmra.mxu1 %v710_v42  ;;  %v642_v42 = vmul.f32 0.7978846, %v626_v60  ;;  %1815 = vtanh.f32 %v641_v54 }
 0x1de   : > { %v1808_v22 = vpop.eup %1807  ;;  %1817 = vtanh.f32 %v642_v42 }
 0x1df   : > { %v670_v13 = vadd.f32 1.0, %v1808_v22  ;;  %v1810_v57 = vpop.eup %1809  ;;  %v1821_v22 = vld [vmem:[%s2689_s5] ss:$0 sm:$0xff] }
 0x1e0   : > { %v1812_v4 = vpop.eup %1811  ;;  %v671_v32 = vadd.f32 1.0, %v1810_v57 }
 0x1e1   : > { %v686_v62 = vmul.f32 0.5, %v670_v13  ;;  %v672_v44 = vadd.f32 1.0, %v1812_v4  ;;  %v1814_v58 = vpop.eup %1813 }
 0x1e2   : > { %v687_v37 = vmul.f32 0.5, %v671_v32  ;;  %v1156_v11 = vmul.f32 %v1814_v58, %v1013_v45  ;;  %vm1162_vm1 = vweird.f32 %v1814_v58 }
 0x1e3   : > { %v702_v7 = vmul.f32 %v686_v62, %v551_v48  ;;  %v688_v50 = vmul.f32 0.5, %v672_v44  ;;  %v1816_v48 = vpop.eup %1815  ;;  %vm1163_vm2 = vmor %vm1161_vm15, %vm1162_vm1 }
 0x1e4   : > { %v703_v51 = vmul.f32 %v687_v37, %v554_v56  ;;  %v1818_v59 = vpop.eup %1817  ;;  %v673_v19 = vadd.f32 1.0, %v1816_v48  ;;  %v1157_v39 = vmul.f32 %v1814_v58, %v1156_v11  ;;  %v1752_v48 = vld [vmem:[%s2694_s10] ss:$0 sm:$0xff] }
 0x1e5   : > { %v712_v46 = vpack.c.bf16 %v702_v7, %v701_v47  ;;  %v704_v9 = vmul.f32 %v688_v50, %v556_v61  ;;  %v674_v63 = vadd.f32 1.0, %v1818_v59 }
 0x1e6   : > { %v689_v12 = vmul.f32 0.5, %v673_v19  ;;  %v1158_v29 = vmul.f32 0.5, %v1157_v39 }
 0x1e7   : > { %v713_v52 = vpack.c.bf16 %v704_v9, %v703_v51  ;;  %v690_v18 = vmul.f32 0.5, %v674_v63 }
 0x1e8   : > { %v705_v34 = vmul.f32 %v689_v12, %v559_v6  ;;  %v1159_v25 = vsub.f32 1.5, %v1158_v29 }
 0x1e9   : > { %v706_v56 = vmul.f32 %v690_v18, %v561_v10 }
 0x1ea   : > { %v1160_v55 = vmul.f32 %v1814_v58, %v1159_v25 }
 0x1eb   : > { %v714_v40 = vpack.c.bf16 %v706_v56, %v705_v34 }
 0x1ec   : > { %811 = vmatmul.bf16.gmra.mxu1 %v711_v33  ;;  %v1164_v15 = vsel %vm1163_vm2, %v1814_v58, %v1160_v55 }
 0x1fc   : > { %816 = vmatmul.bf16.gmra.mxu1 %v712_v46  ;;  %v1735_v46 = vld [vmem:[%s2695_s11] sm:$0xff] }
 0x1fd   : > { %1493 = vmatpush.bf16.msrb.mxu3 %v1735_v46 }
 0x20c   : > { %v982_v36 = vpop.xlane.xlu1 %981  ;;  %821 = vmatmul.bf16.gmra.mxu1 %v713_v52 }
 0x20d   : > { %v998_v61 = vmul.f32 %v982_v36, %v1955_v20  ;;  %v1189_v20 = vmul.f32 %v1164_v15, %v2224_v35 }
 0x20f   : > { %v1014_v1 = vadd.f32 1e-05, %v998_v61  ;;  %v1209_v49 = vmul.f32 %v1821_v22, %v1189_v20 }
 0x211   : > { %1819 = vrsqrt.f32 %v1014_v1  ;;  %vm1171_vm4 = vweird.f32 %v1014_v1  ;;  %v1229_v13 = vadd.f32 %v1822_v5, %v1209_v49 }
 0x217   : > { %v1820_v28 = vpop.eup %1819 }
 0x218   : > { %v1166_v0 = vmul.f32 %v1820_v28, %v1014_v1  ;;  %vm1172_vm3 = vweird.f32 %v1820_v28 }
 0x219   : > { %vm1173_vm5 = vmor %vm1171_vm4, %vm1172_vm3 }
 0x21a   : > { %v1167_v30 = vmul.f32 %v1820_v28, %v1166_v0 }
 0x21c   : > { %v1168_v6 = vmul.f32 0.5, %v1167_v30  ;;  %826 = vmatmul.bf16.gmra.mxu1 %v714_v40 }
 0x21e   : > { %v1169_v16 = vsub.f32 1.5, %v1168_v6 }
 0x220   : > { %v1170_v10 = vmul.f32 %v1820_v28, %v1169_v16 }
 0x222   : > { %v1174_v2 = vsel %vm1173_vm5, %v1820_v28, %v1170_v10 }
 0x223   : > { %v1307_v14 = vpop.f32.mrf.mxu2  ;;  %v1190_v33 = vmul.f32 %v1174_v2, %v2321_v24 }
 0x224   : > { %v1308_v17 = vadd.f32 %v2446_v27, %v1307_v14 }
 0x225   : > { %v1210_v38 = vmul.f32 %v1821_v22, %v1190_v33 }
 0x227   : > { %v1230_v8 = vadd.f32 %v1822_v5, %v1210_v38 }
 0x229   : > { %v1238_v23 = vpack.c.bf16 %v1230_v8, %v1229_v13 }
 0x22b   : > { %v1309_v35 = vpop.f32.mrf.mxu2  ;;  %1695 = vmatmul.msk.bf16.gmra.mxu2 %vm489_vm0, %v1238_v23 }
 0x22c   : > { %v1310_v41 = vadd.f32 %v2446_v27, %v1309_v35 }
 0x22e   : > { %v1335_v24 = vpack.c.bf16 %v1310_v41, %v1308_v17 }
 0x230   : > { %1703 = vmatmul.msk.bf16.gmra.mxu0 %vm1352_vm8, %v1335_v24 }
 0x233   : > { %v1386_v50 = vpop.f32.mrf.mxu0 }
 0x234   : > { %v1312_v26 = vpop.f32.mrf.mxu2  ;;  %v1387_v19 = vadd.f32 %v1752_v48, %v1386_v50 }
 0x235   : > { %v1313_v3 = vadd.f32 %v2446_v27, %v1312_v26 }
 0x236   : > { %v1426_v12 = vmax.f32 %v1387_v19, 0.0 }
 0x23b   : > { %v1388_v51 = vpop.f32.mrf.mxu0 }
 0x23c   : > { %v1314_v62 = vpop.f32.mrf.mxu2  ;;  %v1389_v59 = vadd.f32 %v1752_v48, %v1388_v51  ;;  %v2607_v51 = vld [vmem:[%s2688_s4] ss:$0 sm:$0xff] }
 0x23d   : > { %v1315_v57 = vadd.f32 %v2446_v27, %v1314_v62 }
 0x23e   : > { %v1427_v63 = vmax.f32 %v1389_v59, 0.0 }
 0x23f   : > { %v1336_v21 = vpack.c.bf16 %v1315_v57, %v1313_v3 }
 0x240   : > { %v1442_v18 = vpack.c.bf16 %v1427_v63, %v1426_v12 }
 0x241   : > { %1704 = vmatmul.msk.bf16.gmra.mxu0 %vm1352_vm8, %v1336_v21 }
 0x243   : > { %v1391_v58 = vpop.f32.mrf.mxu0 }
 0x244   : > { %v1317_v53 = vpop.f32.mrf.mxu2  ;;  %v1392_v36 = vadd.f32 %v1752_v48, %v1391_v58 }
 0x245   : > { %v1318_v7 = vadd.f32 %v2446_v27, %v1317_v53 }
 0x246   : > { %v1428_v56 = vmax.f32 %v1392_v36, 0.0 }
 0x24b   : > { %v1393_v11 = vpop.f32.mrf.mxu0 }
 0x24c   : > { %v1319_v47 = vpop.f32.mrf.mxu2  ;;  %v1394_v39 = vadd.f32 %v1752_v48, %v1393_v11 }
 0x24d   : > { %v1320_v4 = vadd.f32 %v2446_v27, %v1319_v47 }
 0x24f   : > { %v1337_v31 = vpack.c.bf16 %v1320_v4, %v1318_v7  ;;  %v792_v7 = vpop.f32.mrf.mxu1 }
 0x251   : > { %1705 = vmatmul.msk.bf16.vlgmr.msra.gmra.mxu3 %vm1352_vm8, %v1337_v31 }
 0x253   : > { %v1396_v34 = vpop.f32.mrf.mxu0 }
 0x254   : > { %v1322_v32 = vpop.f32.mrf.mxu2  ;;  %v1397_v25 = vadd.f32 %v1752_v48, %v1396_v34 }
 0x255   : > { %v1323_v37 = vadd.f32 %v2446_v27, %v1322_v32 }
 0x256   : > { %v1430_v55 = vmax.f32 %v1397_v25, 0.0 }
 0x257   : > { %v794_v4 = vpop.f32.mrf.mxu1 }
 0x258   : > { %v795_v59 = vadd.f32 %v2607_v51, %v794_v4 }
 0x25b   : > { %v1398_v61 = vpop.f32.mrf.mxu0 }
 0x25c   : > { %v1324_v44 = vpop.f32.mrf.mxu2  ;;  %v1399_v29 = vadd.f32 %v1752_v48, %v1398_v61 }
 0x25d   : > { %v1325_v43 = vadd.f32 %v2446_v27, %v1324_v44 }
 0x25e   : > { %v1431_v28 = vmax.f32 %v1399_v29, 0.0 }
 0x25f   : > { %v1338_v60 = vpack.c.bf16 %v1325_v43, %v1323_v37  ;;  %v797_v44 = vpop.f32.mrf.mxu1 }
 0x260   : > { %v1444_v0 = vpack.c.bf16 %v1431_v28, %v1430_v55 }
 0x261   : > { %1706 = vmatmul.msk.bf16.gmra.mxu3 %vm1352_vm8, %v1338_v60 }
 0x2ad   : > { %v1401_v1 = vpop.f32.mrf.mxu0 }
 0x2ae   : > { %v1327_v45 = vpop.f32.mrf.mxu2  ;;  %v1402_v6 = vadd.f32 %v1752_v48, %v1401_v1 }
 0x2af   : > { %v1328_v52 = vadd.f32 %v2446_v27, %v1327_v45  ;;  %v2602_v45 = vld [vmem:[%s2696_s12] ss:$0 sm:$0xff] }
 0x2b0   : > { %v1432_v10 = vmax.f32 %v1402_v6, 0.0 }
 0x2b5   : > { %v1403_v30 = vpop.f32.mrf.mxu0 }
 0x2b6   : > { %v1329_v9 = vpop.f32.mrf.mxu2  ;;  %v1404_v15 = vadd.f32 %v1752_v48, %v1403_v30 }
 0x2b7   : > { %v1330_v54 = vadd.f32 %v2446_v27, %v1329_v9  ;;  %v1429_v27 = vmax.f32 %v1394_v39, 0.0 }
 0x2b8   : > { %v1433_v20 = vmax.f32 %v1404_v15, 0.0 }
 0x2b9   : > { %v1339_v42 = vpack.c.bf16 %v1330_v54, %v1328_v52  ;;  %v1443_v40 = vpack.c.bf16 %v1429_v27, %v1428_v56  ;;  %v793_v52 = vadd.f32 %v2607_v51, %v792_v7 }
 0x2ba   : > { %v1445_v14 = vpack.c.bf16 %v1433_v20, %v1432_v10 }
 0x2bb   : > { %1707 = vmatmul.msk.bf16.gmra.mxu3 %vm1352_vm8, %v1339_v42  ;;  %v799_v42 = vpop.f32.mrf.mxu1 }
 0x2bc   : > { %v800_v56 = vadd.f32 %v2607_v51, %v799_v42 }
 0x2be   : > { %v1406_v16 = vpop.f32.mrf.mxu0 }
 0x2bf   : > { %v1407_v49 = vadd.f32 %v1752_v48, %v1406_v16 }
 0x2c1   : > { %v1434_v5 = vmax.f32 %v1407_v49, 0.0 }
 0x2c3   : > { %v802_v63 = vpop.f32.mrf.mxu1 }
 0x2c4   : > { %v803_v25 = vadd.f32 %v2607_v51, %v802_v63 }
 0x2c6   : > { %v1408_v2 = vpop.f32.mrf.mxu0 }
 0x2c7   : > { %v1409_v22 = vadd.f32 %v1752_v48, %v1408_v2 }
 0x2c9   : > { %v1435_v38 = vmax.f32 %v1409_v22, 0.0 }
 0x2cb   : > { %1712 = vmatmul.msk.bf16.vlgmr.msrb.gmra.mxu3 %vm1352_vm8, %v1442_v18  ;;  %v1446_v13 = vpack.c.bf16 %v1435_v38, %v1434_v5  ;;  %v798_v18 = vadd.f32 %v2607_v51, %v797_v44  ;;  %v804_v36 = vpop.f32.mrf.mxu1 }
 0x2cc   : > { %v805_v30 = vadd.f32 %v2607_v51, %v804_v36 }
 0x2d3   : > { %v807_v1 = vpop.f32.mrf.mxu1 }
 0x2d4   : > { %v1411_v33 = vpop.f32.mrf.mxu3  ;;  %v808_v10 = vadd.f32 %v2607_v51, %v807_v1 }
 0x2d5   : > { %v1412_v23 = vadd.f32 %v1752_v48, %v1411_v33 }
 0x2d7   : > { %v1436_v24 = vmax.f32 %v1412_v23, 0.0 }
 0x2db   : > { %1713 = vmatmul.msk.bf16.gmra.mxu3 %vm1352_vm8, %v1443_v40  ;;  %v809_v6 = vpop.f32.mrf.mxu1 }
 0x2dc   : > { %v1413_v8 = vpop.f32.mrf.mxu3  ;;  %v810_v49 = vadd.f32 %v2607_v51, %v809_v6 }
 0x2dd   : > { %v1414_v35 = vadd.f32 %v1752_v48, %v1413_v8 }
 0x2df   : > { %v1437_v41 = vmax.f32 %v1414_v35, 0.0 }
 0x2e1   : > { %v1447_v26 = vpack.c.bf16 %v1437_v41, %v1436_v24 }
 0x2e3   : > { %v812_v33 = vpop.f32.mrf.mxu1 }
 0x2e4   : > { %v1416_v17 = vpop.f32.mrf.mxu3  ;;  %v813_v35 = vadd.f32 %v2607_v51, %v812_v33 }
 0x2e5   : > { %v1417_v57 = vadd.f32 %v1752_v48, %v1416_v17 }
 0x2e7   : > { %v1438_v53 = vmax.f32 %v1417_v57, 0.0 }
 0x2eb   : > { %1714 = vmatmul.msk.bf16.gmra.mxu3 %vm1352_vm8, %v1444_v0 }
 0x2ec   : > { %v1418_v62 = vpop.f32.mrf.mxu3 }
 0x2ed   : > { %v1419_v3 = vadd.f32 %v1752_v48, %v1418_v62 }
 0x2ef   : > { %v1439_v21 = vmax.f32 %v1419_v3, 0.0 }
 0x2f1   : > { %v1448_v47 = vpack.c.bf16 %v1439_v21, %v1438_v53 }
 0x2fb   : > { %1715 = vmatmul.msk.bf16.gmra.mxu3 %vm1352_vm8, %v1445_v14 }
 0x30b   : > { %1716 = vmatmul.msk.bf16.gmra.mxu3 %vm1352_vm8, %v1446_v13  ;;  %v814_v13 = vpop.f32.mrf.mxu1 }
 0x313   : > { %v817_v41 = vpop.f32.mrf.mxu1 }
 0x314   : > { %v818_v21 = vadd.f32 %v2607_v51, %v817_v41 }
 0x31b   : > { %1717 = vmatmul.msk.bf16.gmra.mxu3 %vm1352_vm8, %v1447_v26  ;;  %v815_v26 = vadd.f32 %v2607_v51, %v814_v13 }
 0x32b   : > { %1718 = vmatmul.msk.bf16.gmra.mxu3 %vm1352_vm8, %v1448_v47  ;;  %v819_v47 = vpop.f32.mrf.mxu1 }
 0x33e   : > { %v1421_v31 = vpop.f32.mrf.mxu3 }
 0x33f   : > { %v1422_v32 = vadd.f32 %v1752_v48, %v1421_v31  ;;  %v820_v31 = vadd.f32 %v2607_v51, %v819_v47 }
 0x341   : > { %v1440_v60 = vmax.f32 %v1422_v32, 0.0 }
 0x346   : > { %v1423_v37 = vpop.f32.mrf.mxu3 }
 0x347   : > { %v1424_v43 = vadd.f32 %v1752_v48, %v1423_v37  ;;  %v822_v37 = vpop.f32.mrf.mxu1 }
 0x349   : > { %v1441_v46 = vmax.f32 %v1424_v43, 0.0 }
 0x34b   : > { %v1449_v50 = vpack.c.bf16 %v1441_v46, %v1440_v60  ;;  %v823_v60 = vadd.f32 %v2607_v51, %v822_v37 }
 0x34d   : > { %1719 = vmatmul.msk.bf16.gmra.mxu3 %vm1352_vm8, %v1449_v50 }
 0x34e   : > { %v1495_v9 = vpop.f32.mrf.mxu3 }
 0x34f   : > { %v1496_v54 = vadd.f32 %v2602_v45, %v1495_v9  ;;  %v824_v9 = vpop.f32.mrf.mxu1 }
 0x351   : > { %v1535_v58 = vadd.f32 %v1496_v54, %v793_v52  ;;  %v825_v54 = vadd.f32 %v2607_v51, %v824_v9 }
 0x353   : > { %1551 = vst.msk [vmem:[%s2617_s21] sm:$0xff] %vm489_vm0, %v1535_v58 }
 0x356   : > { %v1497_v48 = vpop.f32.mrf.mxu3 }
 0x357   : > { %v1498_v19 = vadd.f32 %v2602_v45, %v1497_v48  ;;  %v827_v48 = vpop.f32.mrf.mxu1 }
 0x359   : > { %v1536_v11 = vadd.f32 %v1498_v19, %v795_v59  ;;  %v828_v19 = vadd.f32 %v2607_v51, %v827_v48 }
 0x35b   : > { %1552 = vst.msk [vmem:[%s2617_s21 + $0x8] sm:$0xff] %vm489_vm0, %v1536_v11 }
 0x35e   : > { %v1500_v12 = vpop.f32.mrf.mxu3 }
 0x35f   : > { %v1501_v34 = vadd.f32 %v2602_v45, %v1500_v12  ;;  %v829_v12 = vpop.f32.mrf.mxu1 }
 0x361   : > { %v1537_v39 = vadd.f32 %v1501_v34, %v798_v18  ;;  %v830_v34 = vadd.f32 %v2607_v51, %v829_v12 }
 0x363   : > { %1553 = vst.msk [vmem:[%s2617_s21 + $0x10] sm:$0xff] %vm489_vm0, %v1537_v39 }
 0x366   : > { %v1502_v27 = vpop.f32.mrf.mxu3 }
 0x367   : > { %v1503_v61 = vadd.f32 %v2602_v45, %v1502_v27 }
 0x369   : > { %v1538_v40 = vadd.f32 %v1503_v61, %v800_v56 }
 0x36b   : > { %1554 = vst.msk [vmem:[%s2617_s21 + $0x18] sm:$0xff] %vm489_vm0, %v1538_v40 }
 0x36e   : > { %v1505_v29 = vpop.f32.mrf.mxu3 }
 0x36f   : > { %v1506_v28 = vadd.f32 %v2602_v45, %v1505_v29 }
 0x371   : > { %v1539_v55 = vadd.f32 %v1506_v28, %v803_v25 }
 0x373   : > { %1555 = vst.msk [vmem:[%s2617_s21 + $0x20] sm:$0xff] %vm489_vm0, %v1539_v55 }
 0x376   : > { %v1507_v0 = vpop.f32.mrf.mxu3 }
 0x377   : > { %v1508_v15 = vadd.f32 %v2602_v45, %v1507_v0 }
 0x379   : > { %v1540_v16 = vadd.f32 %v1508_v15, %v805_v30 }
 0x37b   : > { %1556 = vst.msk [vmem:[%s2617_s21 + $0x28] sm:$0xff] %vm489_vm0, %v1540_v16 }
 0x37e   : > { %v1510_v20 = vpop.f32.mrf.mxu3 }
 0x37f   : > { %v1511_v14 = vadd.f32 %v2602_v45, %v1510_v20 }
 0x381   : > { %v1541_v2 = vadd.f32 %v1511_v14, %v808_v10 }
 0x383   : > { %1557 = vst.msk [vmem:[%s2617_s21 + $0x30] sm:$0xff] %vm489_vm0, %v1541_v2 }
 0x386   : > { %v1512_v22 = vpop.f32.mrf.mxu3 }
 0x387   : > { %v1513_v38 = vadd.f32 %v2602_v45, %v1512_v22 }
 0x389   : > { %v1542_v5 = vadd.f32 %v1513_v38, %v810_v49 }
 0x38b   : > { %1558 = vst.msk [vmem:[%s2617_s21 + $0x38] sm:$0xff] %vm489_vm0, %v1542_v5 }
 0x38e   : > { %v1515_v8 = vpop.f32.mrf.mxu3 }
 0x38f   : > { %v1516_v23 = vadd.f32 %v2602_v45, %v1515_v8 }
 0x391   : > { %v1543_v17 = vadd.f32 %v1516_v23, %v813_v35 }
 0x393   : > { %1559 = vst.msk [vmem:[%s2617_s21 + $0x40] sm:$0xff] %vm489_vm0, %v1543_v17 }
 0x396   : > { %v1517_v24 = vpop.f32.mrf.mxu3 }
 0x397   : > { %v1518_v62 = vadd.f32 %v2602_v45, %v1517_v24 }
 0x399   : > { %v1544_v3 = vadd.f32 %v1518_v62, %v815_v26 }
 0x39b   : > { %1560 = vst.msk [vmem:[%s2617_s21 + $0x48] sm:$0xff] %vm489_vm0, %v1544_v3 }
 0x39e   : > { %v1520_v57 = vpop.f32.mrf.mxu3 }
 0x39f   : > { %v1521_v53 = vadd.f32 %v2602_v45, %v1520_v57 }
 0x3a1   : > { %v1545_v7 = vadd.f32 %v1521_v53, %v818_v21 }
 0x3a3   : > { %1561 = vst.msk [vmem:[%s2617_s21 + $0x50] sm:$0xff] %vm489_vm0, %v1545_v7 }
 0x3a6   : > { %v1522_v4 = vpop.f32.mrf.mxu3 }
 0x3a7   : > { %v1523_v32 = vadd.f32 %v2602_v45, %v1522_v4 }
 0x3a9   : > { %v1546_v44 = vadd.f32 %v1523_v32, %v820_v31 }
 0x3ab   : > { %1562 = vst.msk [vmem:[%s2617_s21 + $0x58] sm:$0xff] %vm489_vm0, %v1546_v44 }
 0x3ae   : > { %v1525_v43 = vpop.f32.mrf.mxu3 }
 0x3af   : > { %v1526_v46 = vadd.f32 %v2602_v45, %v1525_v43 }
 0x3b1   : > { %v1547_v50 = vadd.f32 %v1526_v46, %v823_v60 }
 0x3b3   : > { %1563 = vst.msk [vmem:[%s2617_s21 + $0x60] sm:$0xff] %vm489_vm0, %v1547_v50 }
 0x3b6   : > { %v1527_v52 = vpop.f32.mrf.mxu3 }
 0x3b7   : > { %v1528_v42 = vadd.f32 %v2602_v45, %v1527_v52 }
 0x3b9   : > { %v1548_v58 = vadd.f32 %v1528_v42, %v825_v54 }
 0x3bb   : > { %1564 = vst.msk [vmem:[%s2617_s21 + $0x68] sm:$0xff] %vm489_vm0, %v1548_v58 }
 0x3d0   : > { %v1530_v59 = vpop.f32.mrf.mxu3 }
 0x3d1   : > { %v1531_v11 = vadd.f32 %v2602_v45, %v1530_v59 }
 0x3d3   : > { %v1549_v63 = vadd.f32 %v1531_v11, %v828_v19 }
 0x3d5   : > { %1565 = vst.msk [vmem:[%s2617_s21 + $0x70] sm:$0xff] %vm489_vm0, %v1549_v63 }
 0x3d8   : > { %v1532_v18 = vpop.f32.mrf.mxu3 }
 0x3d9   : > { %v1533_v39 = vadd.f32 %v2602_v45, %v1532_v18 }
 0x3db   : > { %v1550_v36 = vadd.f32 %v1533_v39, %v830_v34 }
 0x3dd   : > { %1566 = vst.msk [vmem:[%s2617_s21 + $0x78] sm:$0xff] %vm489_vm0, %v1550_v36 }
 0x3de PF: > { %s23_s25 = sadd.s32 1, %s1829_s25  }
 0x3df   : > { %p20_p4 = scmp.ge.s32.totalorder %s23_s25, 4  }
 0x3e1   :  { %22 = sbr.rel (!%p20_p4) target bundleno = 1 (0x1), region = 102 }

</bundles_post_ra>
